<compile_context>
chip_gen: v5e
topology: v5e:2x2
jax: 0.10.0
libtpu: 0.0.40
codegen_flags: <defaults>
</compile_context>

<pallas_src>
import functools

import jax
import jax.numpy as jnp
from jax import lax
from jax.experimental import pallas as pl
from jax.experimental.pallas import tpu as pltpu

_LANE = 128


def _pna_kernel(a_ref, xa_ref, xt_ref, w_ref, b_ref, o_ref,
                s_acc, mx_acc, mn_acc, *, sub_m):
    """Grid = (row_tiles, neighbor_chunks); axis 1 is the 'arbitrary' reduction axis.

    a_ref  : (tm, nk)          adjacency tile (bf16 exact for binary A)
    xa_ref : (n_cols|nk, F+1)  features + all-ones column (sum & degree in one MXU pass)
    xt_ref : (F, n_cols|nk)    transposed features (neighbors on the lane axis)
    w_ref  : (4F, Cp)  MLP weight    b_ref : (1, Cp)  bias
    o_ref  : (tm, Cp)  output tile
    """
    tm, nk = a_ref.shape
    F = mx_acc.shape[1]
    assert nk % _LANE == 0 and tm % sub_m == 0

    k = pl.program_id(1)

    @pl.when(k == 0)
    def _init():
        s_acc[...] = jnp.zeros_like(s_acc)
        mx_acc[...] = jnp.full_like(mx_acc, -jnp.inf)
        mn_acc[...] = jnp.full_like(mn_acc, jnp.inf)

    # Column offset of this neighbor chunk inside the X refs (k*nk when X is resident
    # across the whole grid, 0 when X is streamed per chunk).
    x_resident = xa_ref.shape[0] != nk
    col0 = pl.multiple_of(k * nk, nk) if x_resident else 0

    # ---- sum + degree: one MXU pass -------------------------------------------------
    # X_aug's last column is all ones, so (A @ X_aug)[:, F] is the degree.  A stays
    # bf16; jnp.dot promotes it so the f32 X keeps the sum/mean path exact vs f32 ref.
    s_acc[...] += jnp.dot(a_ref[...], xa_ref[pl.ds(col0, nk), :],
                          preferred_element_type=jnp.float32)

    # ---- masked max / min, lane-dense, vreg-resident ---------------------------------
    n_lane_grp = nk // _LANE

    @pl.loop(0, tm // sub_m)
    def _rows(r):
        rs = pl.multiple_of(r * sub_m, sub_m)

        def lane_group(c, carry):
            mx_run, mn_run = carry
            cb = pl.multiple_of(c * _LANE, _LANE)
            a_sub = a_ref[pl.ds(rs, sub_m), pl.ds(cb, _LANE)]           # (sub_m, 128) bf16
            m = (a_sub > 0)[:, None, :]                                  # (sub_m, 1, 128)
            xt_c = xt_ref[:, pl.ds(pl.multiple_of(col0 + cb, _LANE), _LANE)][None]  # (1,F,128)
            mx_run = jnp.maximum(
                mx_run, jnp.max(jnp.where(m, xt_c, -jnp.inf), axis=-1))  # XLU lane reduce
            mn_run = jnp.minimum(
                mn_run, jnp.min(jnp.where(m, xt_c, jnp.inf), axis=-1))
            return mx_run, mn_run

        init = (mx_acc[pl.ds(rs, sub_m), :], mn_acc[pl.ds(rs, sub_m), :])
        mx_f, mn_f = lax.fori_loop(0, n_lane_grp, lane_group, init, unroll=True)
        mx_acc[pl.ds(rs, sub_m), :] = mx_f
        mn_acc[pl.ds(rs, sub_m), :] = mn_f

    # ---- finalize: scalers + MLP + ReLU (once per row tile) --------------------------
    @pl.when(k == pl.num_programs(1) - 1)
    def _finalize():
        sd = s_acc[...]                              # (tm, F+1)
        s = sd[:, :F]
        deg = sd[:, F:]                              # (tm, 1)
        has_nbr = deg > 0.0
        mean = s / jnp.maximum(deg, 1.0)             # exact divide; once per row tile
        mx = jnp.where(has_nbr, mx_acc[...], 0.0)    # torch_scatter: 0 for isolated nodes
        mn = jnp.where(has_nbr, mn_acc[...], 0.0)
        # One lane-dense (tm, 4F) @ (4F, Cp) MXU pass instead of four K=F matmuls.
        cat = jnp.concatenate([s, mx, mn, mean], axis=1)
        out = jnp.dot(cat, w_ref[...], preferred_element_type=jnp.float32) + b_ref[...]
        o_ref[...] = jnp.maximum(out, 0.0)           # ReLU update


@functools.partial(jax.jit, static_argnames=("tm", "nk", "a_dtype", "sub_m"))
def pna_aggregator(A, X, W, b, *, tm=256, nk=512, a_dtype=jnp.bfloat16, sub_m=8):
    """PNA 'all' aggregation (sum/max/min/mean) + identity scaler + Linear + ReLU.

    a_dtype=bf16 is exact for binary A and halves the dominant HBM stream; keep f32
    for weighted adjacencies.
    """
    N, F = X.shape
    C = W.shape[1]
    assert W.shape[0] == 4 * F, "W must be (4*F, C) (transposed torch Linear weight)"
    assert sub_m % 8 == 0 and nk % _LANE == 0 and tm % sub_m == 0

    # Clamp tiles to the padded problem; keep >= 2 row tiles when possible so the
    # 'parallel' grid axis shards across both v7x TensorCores.
    tm = max(sub_m, min(tm, pl.cdiv(N, sub_m) * sub_m))
    if pl.cdiv(N, tm) < 2 and N > sub_m:
        tm = pl.cdiv(pl.cdiv(N, 2), sub_m) * sub_m
    nk = max(_LANE, min(nk, pl.cdiv(N, _LANE) * _LANE))

    n_rows = pl.cdiv(N, tm) * tm
    n_cols = pl.cdiv(N, nk) * nk
    Cp = pl.cdiv(C, _LANE) * _LANE               # lane-dense output width

    # Padded neighbor columns are all-zero in A (never pass the mask / add 0); padded
    # rows are isolated nodes whose (discarded) outputs are just relu(b).
    A_p = jnp.pad(A.astype(jnp.float32),
                  ((0, n_rows - N), (0, n_cols - N))).astype(a_dtype)
    X32 = X.astype(jnp.float32)
    X_aug = jnp.pad(jnp.concatenate([X32, jnp.ones((N, 1), jnp.float32)], axis=1),
                    ((0, n_cols - N), (0, 0)))    # (n_cols, F+1), last col = ones
    X_t = jnp.pad(X32.T, ((0, 0), (0, n_cols - N)))   # (F, n_cols)
    W_p = jnp.pad(W.astype(jnp.float32), ((0, 0), (0, Cp - C)))
    b_p = jnp.pad(b.astype(jnp.float32).reshape(1, C), ((0, 0), (0, Cp - C)))

    # Keep X resident in VMEM (one DMA instead of re-streaming per row tile) when it
    # fits a conservative budget (safe for v7x's 64 MiB VMEM / 32 MiB scoped default).
    xaug_vmem = n_cols * max(_LANE, pl.cdiv(F + 1, _LANE) * _LANE) * 4
    xt_vmem = pl.cdiv(F, 8) * 8 * n_cols * 4
    x_resident = (xaug_vmem + xt_vmem) <= 6 * 1024 * 1024
    if x_resident:
        xa_spec = pl.BlockSpec((n_cols, F + 1), lambda i, k: (0, 0))
        xt_spec = pl.BlockSpec((F, n_cols), lambda i, k: (0, 0))
    else:
        xa_spec = pl.BlockSpec((nk, F + 1), lambda i, k: (k, 0))
        xt_spec = pl.BlockSpec((F, nk), lambda i, k: (0, k))

    grid = (n_rows // tm, n_cols // nk)

    out = pl.pallas_call(
        functools.partial(_pna_kernel, sub_m=sub_m),
        out_shape=jax.ShapeDtypeStruct((n_rows, Cp), jnp.float32),
        grid_spec=pltpu.PrefetchScalarGridSpec(
            num_scalar_prefetch=0,
            grid=grid,
            in_specs=[
                pl.BlockSpec((tm, nk), lambda i, k: (i, k)),     # streamed A tile
                xa_spec,                                         # X (+ ones column)
                xt_spec,                                         # X transposed
                pl.BlockSpec((4 * F, Cp), lambda i, k: (0, 0)),  # MLP weight (resident)
                pl.BlockSpec((1, Cp), lambda i, k: (0, 0)),      # bias (resident)
            ],
            out_specs=pl.BlockSpec((tm, Cp), lambda i, k: (i, 0)),
            scratch_shapes=[
                pltpu.VMEM((tm, F + 1), jnp.float32),  # running sum | degree column
                pltpu.VMEM((tm, F), jnp.float32),      # running max
                pltpu.VMEM((tm, F), jnp.float32),      # running min
            ],
        ),
        compiler_params=pltpu.CompilerParams(
            dimension_semantics=("parallel", "arbitrary"),
            vmem_limit_bytes=32 * 1024 * 1024,
        ),
    )(A_p, X_aug, X_t, W_p, b_p)

    return out[:N, :C]


def _reference(A, X, W, b):
    s = A @ X
    deg = jnp.sum(A, axis=1, keepdims=True)
    mean = s / jnp.maximum(deg, 1.0)
    mask = A[:, :, None] > 0.0
    xb = X[None, :, :]
    mx = jnp.max(jnp.where(mask, xb, -jnp.inf), axis=1)
    mn = jnp.min(jnp.where(mask, xb, jnp.inf), axis=1)
    has = deg > 0.0
    mx = jnp.where(has, mx, 0.0)
    mn = jnp.where(has, mn, 0.0)
    cat = jnp.concatenate([s, mx, mn, mean], axis=1)
    return jnp.maximum(cat @ W + b, 0.0)


if __name__ == "__main__":
    key = jax.random.PRNGKey(0)
    k_a, k_x, k_w, k_b = jax.random.split(key, 4)

    N = 200        # nodes (NOT a multiple of the row tile -> exercises padding)
    F_IN = 32      # in_channels
    C_OUT = 8      # out_channels

    # binary adjacency; node 0 made isolated to exercise the deg == 0 path.
    A = (jax.random.uniform(k_a, (N, N)) < 0.3).astype(jnp.float32)
    A = A.at[0].set(0.0)
    X = jax.random.normal(k_x, (N, F_IN), dtype=jnp.float32)

    # deterministic nn.Linear(4*F_IN, C_OUT)-style init (synthetic weights)
    fan_in = 4 * F_IN
    bound = 1.0 / (fan_in ** 0.5)
    W = jax.random.uniform(k_w, (fan_in, C_OUT), minval=-bound, maxval=bound,
                           dtype=jnp.float32)
    b = jax.random.uniform(k_b, (1, C_OUT), minval=-bound, maxval=bound,
                           dtype=jnp.float32)

    # nk=128 -> two neighbor chunks (exercises the reduction axis + accumulators);
    # tm is auto-clamped so the row axis gets two tiles (exercises 'parallel' axis).
    out = pna_aggregator(A, X, W, b, nk=128, a_dtype=jnp.bfloat16)
    out = jax.block_until_ready(out)

    ref = _reference(A, X, W, b)
    assert out.shape == (N, C_OUT)
    assert jnp.allclose(out, ref, atol=1e-3, rtol=1e-3), \
        float(jnp.max(jnp.abs(out - ref)))

    # TODO(synk): 'amplification'/'attenuation' scalers raise NotImplementedError in the
    # PyTorch module, so only the 'identity' scaler path is implemented here.
    # TODO(synk): single-aggregator mode (aggr_func != 'all', no MLP) is not implemented.
    # TODO(synk): for weighted adjacencies keep a_dtype=f32 (bf16/int8 exact only for
    # binary A); mean then divides by the weight sum, matching dense A@X semantics.
    # TODO(synk): int8 storage of A (another 2x HBM saving, most useful on v5e) is left
    # as a follow-up; the kernel only needs the mask compare and the promoted matmul.
    print("KERNEL_OK")
</pallas_src>

<mosaic_0001>
module attributes {stable_mosaic.version = 11 : i64} {
  func.func @_pna_kernel(%arg0: i32, %arg1: i32, %arg2: memref<104x128xbf16, #tpu.memory_space<vmem>>, %arg3: memref<256x33xf32, #tpu.memory_space<vmem>>, %arg4: memref<32x256xf32, #tpu.memory_space<vmem>>, %arg5: memref<128x128xf32, #tpu.memory_space<vmem>>, %arg6: memref<1x128xf32, #tpu.memory_space<vmem>>, %arg7: memref<104x128xf32, #tpu.memory_space<vmem>>, %arg8: memref<104x33xf32, #tpu.memory_space<vmem>>, %arg9: memref<104x32xf32, #tpu.memory_space<vmem>>, %arg10: memref<104x32xf32, #tpu.memory_space<vmem>>) attributes {dimension_semantics = [#tpu.dimension_semantics<parallel>, #tpu.dimension_semantics<arbitrary>], iteration_bounds = array<i64: 2, 2>, scalar_prefetch = 0 : i64, scratch_operands = 3 : i64, tpu.core_type = #tpu.core_type<tc>, window_params = [{transform_indices = @transform_0, window_bounds = array<i64: 104, 128>}, {pipeline_mode = #tpu.pipeline_mode<synchronous>, transform_indices = @transform_1, window_bounds = array<i64: 256, 33>}, {pipeline_mode = #tpu.pipeline_mode<synchronous>, transform_indices = @transform_2, window_bounds = array<i64: 32, 256>}, {pipeline_mode = #tpu.pipeline_mode<synchronous>, transform_indices = @transform_3, window_bounds = array<i64: 128, 128>}, {pipeline_mode = #tpu.pipeline_mode<synchronous>, transform_indices = @transform_4, window_bounds = array<i64: 1, 128>}, {transform_indices = @transform_5, window_bounds = array<i64: 104, 128>}]} {
    %c0_i32 = arith.constant 0 : i32
    %0 = arith.cmpi eq, %arg1, %c0_i32 : i32
    %1 = arith.extui %0 : i1 to i32
    %c0_i32_0 = arith.constant 0 : i32
    %2 = arith.cmpi ne, %1, %c0_i32_0 : i32
    scf.if %2 {
      %cst_11 = arith.constant 0.000000e+00 : f32
      %16 = vector.broadcast %cst_11 : f32 to vector<104x33xf32>
      %c0_12 = arith.constant 0 : index
      %c0_13 = arith.constant 0 : index
      %17 = vector.load %arg8[%c0_12, %c0_13] : memref<104x33xf32, #tpu.memory_space<vmem>>, vector<104x33xf32>
      tpu.vector_store %arg8[%c0_12, %c0_13], %16 {strides = array<i32>} : memref<104x33xf32, #tpu.memory_space<vmem>>, vector<104x33xf32>,
      %cst_14 = arith.constant 0xFF800000 : f32
      %18 = vector.broadcast %cst_14 : f32 to vector<104x32xf32>
      %c0_15 = arith.constant 0 : index
      %c0_16 = arith.constant 0 : index
      %19 = vector.load %arg9[%c0_15, %c0_16] : memref<104x32xf32, #tpu.memory_space<vmem>>, vector<104x32xf32>
      tpu.vector_store %arg9[%c0_15, %c0_16], %18 {strides = array<i32>} : memref<104x32xf32, #tpu.memory_space<vmem>>, vector<104x32xf32>,
      %cst_17 = arith.constant 0x7F800000 : f32
      %20 = vector.broadcast %cst_17 : f32 to vector<104x32xf32>
      %c0_18 = arith.constant 0 : index
      %c0_19 = arith.constant 0 : index
      %21 = vector.load %arg10[%c0_18, %c0_19] : memref<104x32xf32, #tpu.memory_space<vmem>>, vector<104x32xf32>
      tpu.vector_store %arg10[%c0_18, %c0_19], %20 {strides = array<i32>} : memref<104x32xf32, #tpu.memory_space<vmem>>, vector<104x32xf32>,
    } else {
    }
    %c128_i32 = arith.constant 128 : i32
    %3 = arith.muli %arg1, %c128_i32 : i32
    %4 = tpu.assume_multiple %3, 128 : i32
    %c0 = arith.constant 0 : index
    %c0_1 = arith.constant 0 : index
    %5 = vector.load %arg8[%c0, %c0_1] : memref<104x33xf32, #tpu.memory_space<vmem>>, vector<104x33xf32>
    %c0_2 = arith.constant 0 : index
    %c0_3 = arith.constant 0 : index
    %6 = vector.load %arg2[%c0_2, %c0_3] : memref<104x128xbf16, #tpu.memory_space<vmem>>, vector<104x128xbf16>
    %7 = arith.index_cast %4 : i32 to index
    %c0_4 = arith.constant 0 : index
    %8 = vector.load %arg3[%7, %c0_4] : memref<256x33xf32, #tpu.memory_space<vmem>>, vector<128x33xf32>
    %cst = arith.constant dense<0.000000e+00> : vector<104x33xf32>
    %9 = tpu.matmul %6, %8, %cst {dimension_numbers = #tpu.dot_dimension_numbers<[1], [0], [0], [1], [0, 0, 1, 1], [], []>} : vector<104x128xbf16>, vector<128x33xf32>, vector<104x33xf32> -> vector<104x33xf32>
    %10 = arith.addf %5, %9 : vector<104x33xf32>
    %c0_5 = arith.constant 0 : index
    %c0_6 = arith.constant 0 : index
    %11 = vector.load %arg8[%c0_5, %c0_6] : memref<104x33xf32, #tpu.memory_space<vmem>>, vector<104x33xf32>
    tpu.vector_store %arg8[%c0_5, %c0_6], %10 {strides = array<i32>} : memref<104x33xf32, #tpu.memory_space<vmem>>, vector<104x33xf32>,
    %c0_i32_7 = arith.constant 0 : i32
    %c13_i32 = arith.constant 13 : i32
    %12 = arith.addi %c0_i32_7, %c13_i32 : i32
    %c1_i32 = arith.constant 1 : i32
    scf.for %arg11 = %c0_i32_7 to %12 step %c1_i32  : i32 {
      %c1_i32_11 = arith.constant 1 : i32
      %16 = arith.muli %arg11, %c1_i32_11 : i32
      %c0_i32_12 = arith.constant 0 : i32
      %17 = arith.addi %c0_i32_12, %16 : i32
      %c8_i32 = arith.constant 8 : i32
      %18 = arith.muli %17, %c8_i32 : i32
      %19 = tpu.assume_multiple %18, 8 : i32
      %20 = arith.index_cast %19 : i32 to index
      %c0_13 = arith.constant 0 : index
      %21 = vector.load %arg9[%20, %c0_13] : memref<104x32xf32, #tpu.memory_space<vmem>>, vector<8x32xf32>
      %22 = arith.index_cast %19 : i32 to index
      %c0_14 = arith.constant 0 : index
      %23 = vector.load %arg10[%22, %c0_14] : memref<104x32xf32, #tpu.memory_space<vmem>>, vector<8x32xf32>
      %c0_i32_15 = arith.constant 0 : i32
      %c128_i32_16 = arith.constant 128 : i32
      %24 = arith.muli %c0_i32_15, %c128_i32_16 : i32
      %25 = tpu.assume_multiple %24, 128 : i32
      %26 = arith.index_cast %19 : i32 to index
      %27 = arith.index_cast %25 : i32 to index
      %28 = vector.load %arg2[%26, %27] : memref<104x128xbf16, #tpu.memory_space<vmem>>, vector<8x128xbf16>
      %cst_17 = arith.constant 0.000000e+00 : bf16
      %29 = vector.broadcast %cst_17 : bf16 to vector<8x128xbf16>
      %30 = arith.cmpf ogt, %28, %29 : vector<8x128xbf16>
      %31 = vector.shape_cast %30 : vector<8x128xi1> to vector<8x1x128xi1>
      %32 = arith.addi %4, %25 : i32
      %33 = tpu.assume_multiple %32, 128 : i32
      %c0_18 = arith.constant 0 : index
      %34 = arith.index_cast %33 : i32 to index
      %35 = vector.load %arg4[%c0_18, %34] : memref<32x256xf32, #tpu.memory_space<vmem>>, vector<32x128xf32>
      %36 = vector.shape_cast %35 : vector<32x128xf32> to vector<1x32x128xf32>
      %cst_19 = arith.constant 0xFF800000 : f32
      %37 = vector.shape_cast %31 : vector<8x1x128xi1> to vector<8x1x128xi1>
      %38 = vector.broadcast %37 : vector<8x1x128xi1> to vector<8x32x128xi1>
      %39 = vector.shape_cast %36 : vector<1x32x128xf32> to vector<1x32x128xf32>
      %40 = vector.broadcast %39 : vector<1x32x128xf32> to vector<8x32x128xf32>
      %41 = vector.broadcast %cst_19 : f32 to vector<8x32x128xf32>
      %42 = arith.select %38, %40, %41 : vector<8x32x128xi1>, vector<8x32x128xf32>
      %cst_20 = arith.constant dense<0xFF800000> : vector<8x32xf32>
      %43 = vector.multi_reduction <maximumf>, %42, %cst_20 [2] : vector<8x32x128xf32> to vector<8x32xf32>
      %44 = arith.maximumf %21, %43 : vector<8x32xf32>
      %cst_21 = arith.constant 0x7F800000 : f32
      %45 = vector.shape_cast %31 : vector<8x1x128xi1> to vector<8x1x128xi1>
      %46 = vector.broadcast %45 : vector<8x1x128xi1> to vector<8x32x128xi1>
      %47 = vector.shape_cast %36 : vector<1x32x128xf32> to vector<1x32x128xf32>
      %48 = vector.broadcast %47 : vector<1x32x128xf32> to vector<8x32x128xf32>
      %49 = vector.broadcast %cst_21 : f32 to vector<8x32x128xf32>
      %50 = arith.select %46, %48, %49 : vector<8x32x128xi1>, vector<8x32x128xf32>
      %cst_22 = arith.constant dense<0x7F800000> : vector<8x32xf32>
      %51 = vector.multi_reduction <minimumf>, %50, %cst_22 [2] : vector<8x32x128xf32> to vector<8x32xf32>
      %52 = arith.minimumf %23, %51 : vector<8x32xf32>
      %c1_i32_23 = arith.constant 1 : i32
      %53 = arith.index_cast %19 : i32 to index
      %c0_24 = arith.constant 0 : index
      %54 = vector.load %arg9[%53, %c0_24] : memref<104x32xf32, #tpu.memory_space<vmem>>, vector<8x32xf32>
      tpu.vector_store %arg9[%53, %c0_24], %44 {strides = array<i32>} : memref<104x32xf32, #tpu.memory_space<vmem>>, vector<8x32xf32>,
      %55 = arith.index_cast %19 : i32 to index
      %c0_25 = arith.constant 0 : index
      %56 = vector.load %arg10[%55, %c0_25] : memref<104x32xf32, #tpu.memory_space<vmem>>, vector<8x32xf32>
      tpu.vector_store %arg10[%55, %c0_25], %52 {strides = array<i32>} : memref<104x32xf32, #tpu.memory_space<vmem>>, vector<8x32xf32>,
    }
    %c13_i32_8 = arith.constant 13 : i32
    %c1_i32_9 = arith.constant 1 : i32
    %13 = arith.cmpi eq, %arg1, %c1_i32_9 : i32
    %14 = arith.extui %13 : i1 to i32
    %c0_i32_10 = arith.constant 0 : i32
    %15 = arith.cmpi ne, %14, %c0_i32_10 : i32
    scf.if %15 {
      %c0_11 = arith.constant 0 : index
      %c0_12 = arith.constant 0 : index
      %16 = vector.load %arg8[%c0_11, %c0_12] : memref<104x33xf32, #tpu.memory_space<vmem>>, vector<104x33xf32>
      %17 = vector.extract_strided_slice %16 {offsets = [0, 0], sizes = [104, 32], strides = [1, 1]} : vector<104x33xf32> to vector<104x32xf32>
      %18 = vector.extract_strided_slice %16 {offsets = [0, 32], sizes = [104, 1], strides = [1, 1]} : vector<104x33xf32> to vector<104x1xf32>
      %cst_13 = arith.constant 0.000000e+00 : f32
      %19 = vector.broadcast %cst_13 : f32 to vector<104x1xf32>
      %20 = arith.cmpf ogt, %18, %19 : vector<104x1xf32>
      %cst_14 = arith.constant 1.000000e+00 : f32
      %21 = vector.broadcast %cst_14 : f32 to vector<104x1xf32>
      %22 = arith.maximumf %18, %21 : vector<104x1xf32>
      %23 = vector.broadcast %22 : vector<104x1xf32> to vector<104x32xf32>
      %24 = arith.divf %17, %23 : vector<104x32xf32>
      %c0_15 = arith.constant 0 : index
      %c0_16 = arith.constant 0 : index
      %25 = vector.load %arg9[%c0_15, %c0_16] : memref<104x32xf32, #tpu.memory_space<vmem>>, vector<104x32xf32>
      %cst_17 = arith.constant 0.000000e+00 : f32
      %26 = vector.shape_cast %20 : vector<104x1xi1> to vector<104x1xi1>
      %27 = vector.broadcast %26 : vector<104x1xi1> to vector<104x32xi1>
      %28 = vector.broadcast %cst_17 : f32 to vector<104x32xf32>
      %29 = arith.select %27, %25, %28 : vector<104x32xi1>, vector<104x32xf32>
      %c0_18 = arith.constant 0 : index
      %c0_19 = arith.constant 0 : index
      %30 = vector.load %arg10[%c0_18, %c0_19] : memref<104x32xf32, #tpu.memory_space<vmem>>, vector<104x32xf32>
      %cst_20 = arith.constant 0.000000e+00 : f32
      %31 = vector.shape_cast %20 : vector<104x1xi1> to vector<104x1xi1>
      %32 = vector.broadcast %31 : vector<104x1xi1> to vector<104x32xi1>
      %33 = vector.broadcast %cst_20 : f32 to vector<104x32xf32>
      %34 = arith.select %32, %30, %33 : vector<104x32xi1>, vector<104x32xf32>
      %35 = tpu.concatenate %17, %29, %34, %24 in 1 : vector<104x32xf32>, vector<104x32xf32>, vector<104x32xf32>, vector<104x32xf32> -> vector<104x128xf32>
      %c0_21 = arith.constant 0 : index
      %c0_22 = arith.constant 0 : index
      %36 = vector.load %arg5[%c0_21, %c0_22] : memref<128x128xf32, #tpu.memory_space<vmem>>, vector<128x128xf32>
      %cst_23 = arith.constant dense<0.000000e+00> : vector<104x128xf32>
      %37 = tpu.matmul %35, %36, %cst_23 {dimension_numbers = #tpu.dot_dimension_numbers<[1], [0], [0], [1], [0, 0, 1, 1], [], []>} : vector<104x128xf32>, vector<128x128xf32>, vector<104x128xf32> -> vector<104x128xf32>
      %c0_24 = arith.constant 0 : index
      %c0_25 = arith.constant 0 : index
      %38 = vector.load %arg6[%c0_24, %c0_25] : memref<1x128xf32, #tpu.memory_space<vmem>>, vector<1x128xf32>
      %39 = vector.broadcast %38 : vector<1x128xf32> to vector<104x128xf32>
      %40 = arith.addf %37, %39 : vector<104x128xf32>
      %cst_26 = arith.constant 0.000000e+00 : f32
      %41 = vector.broadcast %cst_26 : f32 to vector<104x128xf32>
      %42 = arith.maximumf %40, %41 : vector<104x128xf32>
      %c0_27 = arith.constant 0 : index
      %c0_28 = arith.constant 0 : index
      %43 = vector.load %arg7[%c0_27, %c0_28] : memref<104x128xf32, #tpu.memory_space<vmem>>, vector<104x128xf32>
      tpu.vector_store %arg7[%c0_27, %c0_28], %42 {strides = array<i32>} : memref<104x128xf32, #tpu.memory_space<vmem>>, vector<104x128xf32>,
    } else {
    }
    return
  }
  func.func @transform_0(%arg0: i32, %arg1: i32) -> (i32, i32) {
    %c0_i32 = arith.constant 0 : i32
    return %arg0, %arg1 : i32, i32
  }
  func.func @transform_1(%arg0: i32, %arg1: i32) -> (i32, i32) {
    %c0_i32 = arith.constant 0 : i32
    %c0_i32_0 = arith.constant 0 : i32
    %c0_i32_1 = arith.constant 0 : i32
    return %c0_i32, %c0_i32_0 : i32, i32
  }
  func.func @transform_2(%arg0: i32, %arg1: i32) -> (i32, i32) {
    %c0_i32 = arith.constant 0 : i32
    %c0_i32_0 = arith.constant 0 : i32
    %c0_i32_1 = arith.constant 0 : i32
    return %c0_i32, %c0_i32_0 : i32, i32
  }
  func.func @transform_3(%arg0: i32, %arg1: i32) -> (i32, i32) {
    %c0_i32 = arith.constant 0 : i32
    %c0_i32_0 = arith.constant 0 : i32
    %c0_i32_1 = arith.constant 0 : i32
    return %c0_i32, %c0_i32_0 : i32, i32
  }
  func.func @transform_4(%arg0: i32, %arg1: i32) -> (i32, i32) {
    %c0_i32 = arith.constant 0 : i32
    %c0_i32_0 = arith.constant 0 : i32
    %c0_i32_1 = arith.constant 0 : i32
    return %c0_i32, %c0_i32_0 : i32, i32
  }
  func.func @transform_5(%arg0: i32, %arg1: i32) -> (i32, i32) {
    %c0_i32 = arith.constant 0 : i32
    %c0_i32_0 = arith.constant 0 : i32
    return %arg0, %c0_i32 : i32, i32
  }
}

</mosaic_0001>

<bundles_post_ra>
// kernel: pna_aggregator.1
= control target key start
LH: loop header
LB: loop body
LE: loop exit
PB: predicated region body
PF: predicated region fallthrough
CT: control target
= control target key end

     0   :  { %s2276_s18 = smov 0   ;;  %s2278_s19 = smov 0   ;;  %s3432_s0 = inlined_call_operand.vmem [shape: bf16[208,256], index: 0, kind: input, shape index: {}]   ;;  %s3433_s1 = inlined_call_operand.vmem [shape: f32[256,33], index: 1, kind: input, shape index: {}]   ;;  %s3434_s2 = inlined_call_operand.vmem [shape: f32[32,256], index: 2, kind: input, shape index: {}]   ;;  %s3435_s3 = inlined_call_operand.vmem [shape: f32[128,128], index: 3, kind: input, shape index: {}]   ;;  %s3436_s4 = inlined_call_operand.vmem [shape: f32[1,128], index: 4, kind: input, shape index: {}]   ;;  %s3437_s5 = inlined_call_operand.vmem [shape: f32[208,128], index: 5, kind: output, shape index: {}]  }
   0x1   :  { %s2280_s20 = smov 0   ;;  %s2282_s21 = smov 0  }
   0x2   :  { %s2284_s22 = smov 0   ;;  %s2286_s23 = smov 0  }
   0x3   :  { %s2288_s24 = smov 0  }
   0x4 LB: > { %s24_s25 = sadd.s32 1, %s2223_s22  ;;  %s27_s26 = sadd.s32 1, %s2227_s23  ;;  %s2231_s24 = sphi %s2288_s24, %s15_s24   ;;  %s2227_s23 = sphi %s2286_s23, %s3515_s23   ;;  %s2223_s22 = sphi %s2284_s22, %s3514_s22   ;;  %s2219_s21 = sphi %s2282_s21, %s3513_s21   ;;  %s2215_s20 = sphi %s2280_s20, %s3512_s20   ;;  %s2211_s19 = sphi %s2278_s19, %s3511_s19   ;;  %s2207_s18 = sphi %s2276_s18, %s3510_s18  }
   0x5   : > { %p25_p0 = scmp.ge.s32.totalorder %s24_s25, 2  ;;  %p43_p1 = scmp.ne.s32.totalorder %s2211_s19, %s2207_s18 }
   0x6   : > { %p44_p2 = scmp.eq.s32.totalorder %s2231_s24, 0  ;;  %s36_s30 = sadd.s32 1, %s2211_s19 }
   0x7   : > { %s3517_s25 = smov (%p25_p0, %s24_s25), 0  ;;  %s3519_s26 = smov (!%p25_p0, %s27_s26), %s2227_s23 }
   0x8   : > { %p45_p3 = por %p44_p2, %p43_p1  ;;  %p29_p4 = scmp.ge.s32.totalorder %s3519_s26, 2 }
   0x9   : > { %s32_s27 = ssub.s32 %s2223_s22, %s3517_s25  ;;  %p1826_p6 = scmp.ge.s32.totalorder %s2231_s24, 4 }
   0xa   : > { %s3521_s26 = smov (%p29_p4, %s3519_s26), 0 }
   0xb   : > { %s31_s28 = ssub.s32 %s2227_s23, %s3521_s26  ;;  %191 = sbr.rel (%p1826_p6) target bundleno = 36 (0x24), region = 32 }
   0xc   : > { %s33_s29 = sor.u32 %s32_s27, %s31_s28 }
   0xd   : > { %p34_p5 = scmp.eq.s32.totalorder %s33_s29, 0 }
   0xf   : > { %s2327_s6 = scalar_select %p34_p5, %s2211_s19, %s36_s30  }
  0x10   : > { %194 = sbr.rel (!%p45_p3) target bundleno = 36 (0x24), region = 36  ;;  %s196_s7 = sand.u32 (%p45_p3), 1, %s2211_s19  }
  0x11   : > { %s1863_s8 = smul.u32 (%p45_p3), 26, %s2227_s23 }
  0x12   : > { %s1966_s9 = smul.u32 (%p45_p3), 52, %s196_s7 }
  0x13   : > { %s201_s10 = sadd.s32 (%p45_p3), %s2223_s22, %s1863_s8 }
  0x14   : > { %s1828_s11 = sshll.u32 (%p45_p3), %s201_s10, 2  ;;  %s198_s15 = scalar_lea.vmem (%p45_p3), [#allocation5], %s1966_s9 }
  0x15   : > { %s203_s14 = scalar_lea.vmem %s3432_s0, %s1828_s11 }
  0x16   : > { %v220_v0 = vld [vmem:[%s203_s14] sm:$0xf]  ;;  %v222_v1 = vld [vmem:[%s203_s14 + $0x8] sm:$0xf]  ;;  %v224_v2 = vld [vmem:[%s203_s14 + $0x10] sm:$0xf] }
  0x17   : > { %221 = vst [vmem:[%s198_s15] sm:$0xf] %v220_v0  ;;  %v226_v3 = vld [vmem:[%s203_s14 + $0x18] sm:$0xf]  ;;  %v228_v4 = vld [vmem:[%s203_s14 + $0x20] sm:$0xf] }
  0x18   : > { %223 = vst [vmem:[%s198_s15 + $0x4] sm:$0xf] %v222_v1  ;;  %v230_v5 = vld [vmem:[%s203_s14 + $0x28] sm:$0xf]  ;;  %v232_v6 = vld [vmem:[%s203_s14 + $0x30] sm:$0xf] }
  0x19   : > { %225 = vst [vmem:[%s198_s15 + $0x8] sm:$0xf] %v224_v2  ;;  %v234_v7 = vld [vmem:[%s203_s14 + $0x38] sm:$0xf]  ;;  %v236_v8 = vld [vmem:[%s203_s14 + $0x40] sm:$0xf] }
  0x1a   : > { %227 = vst [vmem:[%s198_s15 + $0xc] sm:$0xf] %v226_v3  ;;  %v238_v9 = vld [vmem:[%s203_s14 + $0x48] sm:$0xf]  ;;  %v240_v10 = vld [vmem:[%s203_s14 + $0x50] sm:$0xf] }
  0x1b   : > { %229 = vst [vmem:[%s198_s15 + $0x10] sm:$0xf] %v228_v4  ;;  %v242_v11 = vld [vmem:[%s203_s14 + $0x58] sm:$0xf]  ;;  %v244_v12 = vld [vmem:[%s203_s14 + $0x60] sm:$0xf] }
  0x1c   : > { %231 = vst [vmem:[%s198_s15 + $0x14] sm:$0xf] %v230_v5 }
  0x1d   : > { %233 = vst [vmem:[%s198_s15 + $0x18] sm:$0xf] %v232_v6 }
  0x1e   : > { %235 = vst [vmem:[%s198_s15 + $0x1c] sm:$0xf] %v234_v7 }
  0x1f   : > { %237 = vst [vmem:[%s198_s15 + $0x20] sm:$0xf] %v236_v8 }
  0x20   : > { %239 = vst [vmem:[%s198_s15 + $0x24] sm:$0xf] %v238_v9 }
  0x21   : > { %241 = vst [vmem:[%s198_s15 + $0x28] sm:$0xf] %v240_v10 }
  0x22   : > { %243 = vst [vmem:[%s198_s15 + $0x2c] sm:$0xf] %v242_v11 }
  0x23   : > { %245 = vst [vmem:[%s198_s15 + $0x30] sm:$0xf] %v244_v12 }
  0x24 PF: > { %p1829_p7 = scmp.ge.s32.totalorder %s2231_s24, 1  ;;  %p294_p8 = scmp.lt.s32.totalorder %s2231_s24, 5 }
  0x26   : > { %p295_p9 = pnand %p1829_p7, %p294_p8 }
  0x27   : > { %s301_s16 = sand.u32 (!%p295_p9), 1, %s2207_s18   ;;  %s329_s17 = smul.u32 (!%p295_p9), 13, %s2219_s21 }
  0x28   : > { %298 = sbr.rel (%p295_p9) target bundleno = 1070 (0x42e), region = 77  ;;  %p1831_p11 = scmp.ne.s32.totalorder (!%p295_p9), %s2215_s20, 0 }
  0x29   : > { %s1967_s27 = smul.u32 (!%p295_p9), 52, %s301_s16  ;;  %p330_p10 = scmp.lt.s32.totalorder (!%p295_p9), %s329_s17, 25 }
  0x2b   : > { %s2345_s8 = scalar_lea.vmem (!%p295_p9), [#allocation5], %s1967_s27 }
  0x2d   : > { %s3523_s17 = smov (!%p330_p10, %s329_s17), 25  ;;  %338 = sbr.rel (%p1831_p11) target bundleno = 90 (0x5a), region = 85 }
  0x2e   : > { %s1830_s28 = sshll.u32 %s3523_s17, 3 }
  0x2f   : > { %s2343_s7 = scalar_lea.vmem %s3437_s5, %s1830_s28 }
  0x32   : > { %vm339_vm0 = vcmask 269312   ;;  %v2237_v13 = vmov 0.0   ;;  %vm353_vm1 = vcmask 261120   ;;  %v2238_v14 = vmov -inf  }
  0x33   : > { %340 = vst.msk [vmem:[#allocation2] sm:$0xff] %vm339_vm0, %v2237_v13  ;;  %v2239_v15 = vmov inf  }
  0x34   : > { %341 = vst.msk [vmem:[#allocation2 + $0x8] sm:$0xff] %vm339_vm0, %v2237_v13 }
  0x35   : > { %342 = vst.msk [vmem:[#allocation2 + $0x10] sm:$0xff] %vm339_vm0, %v2237_v13 }
  0x36   : > { %343 = vst.msk [vmem:[#allocation2 + $0x18] sm:$0xff] %vm339_vm0, %v2237_v13 }
  0x37   : > { %344 = vst.msk [vmem:[#allocation2 + $0x20] sm:$0xff] %vm339_vm0, %v2237_v13 }
  0x38   : > { %345 = vst.msk [vmem:[#allocation2 + $0x28] sm:$0xff] %vm339_vm0, %v2237_v13 }
  0x39   : > { %346 = vst.msk [vmem:[#allocation2 + $0x30] sm:$0xff] %vm339_vm0, %v2237_v13 }
  0x3a   : > { %347 = vst.msk [vmem:[#allocation2 + $0x38] sm:$0xff] %vm339_vm0, %v2237_v13 }
  0x3b   : > { %348 = vst.msk [vmem:[#allocation2 + $0x40] sm:$0xff] %vm339_vm0, %v2237_v13 }
  0x3c   : > { %349 = vst.msk [vmem:[#allocation2 + $0x48] sm:$0xff] %vm339_vm0, %v2237_v13 }
  0x3d   : > { %350 = vst.msk [vmem:[#allocation2 + $0x50] sm:$0xff] %vm339_vm0, %v2237_v13 }
  0x3e   : > { %351 = vst.msk [vmem:[#allocation2 + $0x58] sm:$0xff] %vm339_vm0, %v2237_v13 }
  0x3f   : > { %352 = vst.msk [vmem:[#allocation2 + $0x60] sm:$0xff] %vm339_vm0, %v2237_v13 }
  0x40   : > { %354 = vst.msk [vmem:[#allocation3] sm:$0xff] %vm353_vm1, %v2238_v14 }
  0x41   : > { %355 = vst.msk [vmem:[#allocation3 + $0x8] sm:$0xff] %vm353_vm1, %v2238_v14 }
  0x42   : > { %356 = vst.msk [vmem:[#allocation3 + $0x10] sm:$0xff] %vm353_vm1, %v2238_v14 }
  0x43   : > { %357 = vst.msk [vmem:[#allocation3 + $0x18] sm:$0xff] %vm353_vm1, %v2238_v14 }
  0x44   : > { %358 = vst.msk [vmem:[#allocation3 + $0x20] sm:$0xff] %vm353_vm1, %v2238_v14 }
  0x45   : > { %359 = vst.msk [vmem:[#allocation3 + $0x28] sm:$0xff] %vm353_vm1, %v2238_v14 }
  0x46   : > { %360 = vst.msk [vmem:[#allocation3 + $0x30] sm:$0xff] %vm353_vm1, %v2238_v14 }
  0x47   : > { %361 = vst.msk [vmem:[#allocation3 + $0x38] sm:$0xff] %vm353_vm1, %v2238_v14 }
  0x48   : > { %362 = vst.msk [vmem:[#allocation3 + $0x40] sm:$0xff] %vm353_vm1, %v2238_v14 }
  0x49   : > { %363 = vst.msk [vmem:[#allocation3 + $0x48] sm:$0xff] %vm353_vm1, %v2238_v14 }
  0x4a   : > { %364 = vst.msk [vmem:[#allocation3 + $0x50] sm:$0xff] %vm353_vm1, %v2238_v14 }
  0x4b   : > { %365 = vst.msk [vmem:[#allocation3 + $0x58] sm:$0xff] %vm353_vm1, %v2238_v14 }
  0x4c   : > { %366 = vst.msk [vmem:[#allocation3 + $0x60] sm:$0xff] %vm353_vm1, %v2238_v14 }
  0x4d   : > { %367 = vst.msk [vmem:[#allocation4] sm:$0xff] %vm353_vm1, %v2239_v15 }
  0x4e   : > { %368 = vst.msk [vmem:[#allocation4 + $0x8] sm:$0xff] %vm353_vm1, %v2239_v15 }
  0x4f   : > { %369 = vst.msk [vmem:[#allocation4 + $0x10] sm:$0xff] %vm353_vm1, %v2239_v15 }
  0x50   : > { %370 = vst.msk [vmem:[#allocation4 + $0x18] sm:$0xff] %vm353_vm1, %v2239_v15 }
  0x51   : > { %371 = vst.msk [vmem:[#allocation4 + $0x20] sm:$0xff] %vm353_vm1, %v2239_v15 }
  0x52   : > { %372 = vst.msk [vmem:[#allocation4 + $0x28] sm:$0xff] %vm353_vm1, %v2239_v15 }
  0x53   : > { %373 = vst.msk [vmem:[#allocation4 + $0x30] sm:$0xff] %vm353_vm1, %v2239_v15 }
  0x54   : > { %374 = vst.msk [vmem:[#allocation4 + $0x38] sm:$0xff] %vm353_vm1, %v2239_v15 }
  0x55   : > { %375 = vst.msk [vmem:[#allocation4 + $0x40] sm:$0xff] %vm353_vm1, %v2239_v15 }
  0x56   : > { %376 = vst.msk [vmem:[#allocation4 + $0x48] sm:$0xff] %vm353_vm1, %v2239_v15 }
  0x57   : > { %377 = vst.msk [vmem:[#allocation4 + $0x50] sm:$0xff] %vm353_vm1, %v2239_v15 }
  0x58   : > { %378 = vst.msk [vmem:[#allocation4 + $0x58] sm:$0xff] %vm353_vm1, %v2239_v15 }
  0x59   : > { %379 = vst.msk [vmem:[#allocation4 + $0x60] sm:$0xff] %vm353_vm1, %v2239_v15 }
  0x5a PF: > { %s1832_s18 = sshll.u32 %s2215_s20, 7  ;;  %v1865_v32 = vld [vmem:[%s2345_s8 + $0x8] sm:$0xff]  ;;  %v1867_v33 = vld [vmem:[%s2345_s8 + $0x18] sm:$0xff]  ;;  %v1864_v35 = vld [vmem:[%s2345_s8] sm:$0xff]  ;;  %vm528_vm2 = vcmask 269312   ;;  %s2418_s11 = smov 0  }
  0x5b   : > { %s2380_s10 = scalar_lea.vmem %s3433_s1, %s1832_s18  ;;  %v1869_v34 = vld [vmem:[%s2345_s8 + $0x28] sm:$0xff]  ;;  %v406_v36 = vld [vmem:[%s2345_s8 + $0x30] sm:$0xf]  ;;  %v1868_v39 = vld [vmem:[%s2345_s8 + $0x20] sm:$0xff] }
  0x5c   : > { %v423_v16 = vld [vmem:[%s2380_s10 + $0x78] sm:$0xff]  ;;  %v422_v17 = vld [vmem:[%s2380_s10 + $0x70] sm:$0xff]  ;;  %v421_v18 = vld [vmem:[%s2380_s10 + $0x68] sm:$0xff]  ;;  %v449_v37 = vunpack.c.l.b16 %v406_v36 }
  0x5d   : > { %1870 = vmatpush.msra.mxu1 %v423_v16  ;;  %1871 = vmatpush.msra.mxu2 %v423_v16  ;;  %v420_v19 = vld [vmem:[%s2380_s10 + $0x60] sm:$0xff]  ;;  %v419_v20 = vld [vmem:[%s2380_s10 + $0x58] sm:$0xff]  ;;  %v418_v21 = vld [vmem:[%s2380_s10 + $0x50] sm:$0xff] }
  0x5e   : > { %1872 = vmatpush.msra.mxu3 %v423_v16  ;;  %464 = vmatpush.msra.mxu0 %v423_v16  ;;  %v417_v22 = vld [vmem:[%s2380_s10 + $0x48] sm:$0xff]  ;;  %v416_v23 = vld [vmem:[%s2380_s10 + $0x40] sm:$0xff]  ;;  %v415_v24 = vld [vmem:[%s2380_s10 + $0x38] sm:$0xff]  ;;  %v456_v40 = vpack.c.b16 %v449_v37, %v449_v37 }
  0x5f   : > { %1873 = vmatpush.msra.mxu1 %v422_v17  ;;  %1874 = vmatpush.msra.mxu2 %v422_v17  ;;  %v414_v25 = vld [vmem:[%s2380_s10 + $0x30] sm:$0xff]  ;;  %v413_v26 = vld [vmem:[%s2380_s10 + $0x28] sm:$0xff]  ;;  %v412_v27 = vld [vmem:[%s2380_s10 + $0x20] sm:$0xff] }
  0x60   : > { %1875 = vmatpush.msra.mxu3 %v422_v17  ;;  %465 = vmatpush.msra.mxu0 %v422_v17  ;;  %v411_v28 = vld [vmem:[%s2380_s10 + $0x18] sm:$0xff]  ;;  %v410_v29 = vld [vmem:[%s2380_s10 + $0x10] sm:$0xff]  ;;  %v409_v30 = vld [vmem:[%s2380_s10 + $0x8] sm:$0xff] }
  0x61   : > { %1876 = vmatpush.msra.mxu1 %v421_v18  ;;  %1877 = vmatpush.msra.mxu2 %v421_v18  ;;  %v408_v31 = vld [vmem:[%s2380_s10] sm:$0xff]  ;;  %v383_v41 = vld [vmem:[#allocation2 + $0x10] sm:$0xff]  ;;  %v384_v49 = vld [vmem:[#allocation2 + $0x18] sm:$0xff] }
  0x62   : > { %1878 = vmatpush.msra.mxu3 %v421_v18  ;;  %466 = vmatpush.msra.mxu0 %v421_v18  ;;  %v1866_v38 = vld [vmem:[%s2345_s8 + $0x10] sm:$0xff]  ;;  %v387_v47 = vld [vmem:[#allocation2 + $0x30] sm:$0xff] }
  0x63   : > { %1879 = vmatpush.msra.mxu1 %v420_v19  ;;  %1880 = vmatpush.msra.mxu2 %v420_v19  ;;  %v381_v44 = vld [vmem:[#allocation2] sm:$0xff]  ;;  %v391_v48 = vld [vmem:[#allocation2 + $0x50] sm:$0xff]  ;;  %v382_v56 = vld [vmem:[#allocation2 + $0x8] sm:$0xff] }
  0x64   : > { %1881 = vmatpush.msra.mxu3 %v420_v19  ;;  %467 = vmatpush.msra.mxu0 %v420_v19  ;;  %v388_v59 = vld [vmem:[#allocation2 + $0x38] sm:$0xff]  ;;  %v385_v61 = vld [vmem:[#allocation2 + $0x20] sm:$0xff]  ;;  %v386_v6 = vld [vmem:[#allocation2 + $0x28] sm:$0xff] }
  0x65   : > { %1882 = vmatpush.msra.mxu1 %v419_v20  ;;  %1883 = vmatpush.msra.mxu2 %v419_v20  ;;  %v392_v60 = vld [vmem:[#allocation2 + $0x58] sm:$0xff]  ;;  %v389_v4 = vld [vmem:[#allocation2 + $0x40] sm:$0xff]  ;;  %v390_v13 = vld [vmem:[#allocation2 + $0x48] sm:$0xff] }
  0x66   : > { %1884 = vmatpush.msra.mxu3 %v419_v20  ;;  %468 = vmatpush.msra.mxu0 %v419_v20  ;;  %v393_v5 = vld [vmem:[#allocation2 + $0x60] sm:$0xff] }
  0x67   : > { %1885 = vmatpush.msra.mxu1 %v418_v21  ;;  %1886 = vmatpush.msra.mxu2 %v418_v21 }
  0x68   : > { %1887 = vmatpush.msra.mxu3 %v418_v21  ;;  %469 = vmatpush.msra.mxu0 %v418_v21 }
  0x69   : > { %1888 = vmatpush.msra.mxu1 %v417_v22  ;;  %1889 = vmatpush.msra.mxu2 %v417_v22 }
  0x6a   : > { %1890 = vmatpush.msra.mxu3 %v417_v22  ;;  %470 = vmatpush.msra.mxu0 %v417_v22 }
  0x6b   : > { %1891 = vmatpush.msra.mxu1 %v416_v23  ;;  %1892 = vmatpush.msra.mxu2 %v416_v23 }
  0x6c   : > { %1893 = vmatpush.msra.mxu3 %v416_v23  ;;  %471 = vmatpush.msra.mxu0 %v416_v23 }
  0x6d   : > { %1894 = vmatpush.msra.mxu1 %v415_v24  ;;  %1895 = vmatpush.msra.mxu2 %v415_v24 }
  0x6e   : > { %1896 = vmatpush.msra.mxu3 %v415_v24  ;;  %472 = vmatpush.msra.mxu0 %v415_v24 }
  0x6f   : > { %1897 = vmatpush.msra.mxu1 %v414_v25  ;;  %1898 = vmatpush.msra.mxu2 %v414_v25 }
  0x70   : > { %1899 = vmatpush.msra.mxu3 %v414_v25  ;;  %473 = vmatpush.msra.mxu0 %v414_v25 }
  0x71   : > { %1900 = vmatpush.msra.mxu1 %v413_v26  ;;  %1901 = vmatpush.msra.mxu2 %v413_v26 }
  0x72   : > { %1902 = vmatpush.msra.mxu3 %v413_v26  ;;  %474 = vmatpush.msra.mxu0 %v413_v26 }
  0x73   : > { %1903 = vmatpush.msra.mxu1 %v412_v27  ;;  %1904 = vmatpush.msra.mxu2 %v412_v27 }
  0x74   : > { %1905 = vmatpush.msra.mxu3 %v412_v27  ;;  %475 = vmatpush.msra.mxu0 %v412_v27 }
  0x75   : > { %1906 = vmatpush.msra.mxu1 %v411_v28  ;;  %1907 = vmatpush.msra.mxu2 %v411_v28 }
  0x76   : > { %1908 = vmatpush.msra.mxu3 %v411_v28  ;;  %476 = vmatpush.msra.mxu0 %v411_v28 }
  0x77   : > { %1909 = vmatpush.msra.mxu1 %v410_v29  ;;  %1910 = vmatpush.msra.mxu2 %v410_v29 }
  0x78   : > { %1911 = vmatpush.msra.mxu3 %v410_v29  ;;  %477 = vmatpush.msra.mxu0 %v410_v29 }
  0x79   : > { %1912 = vmatpush.msra.mxu1 %v409_v30  ;;  %1913 = vmatpush.msra.mxu2 %v409_v30 }
  0x7a   : > { %1914 = vmatpush.msra.mxu3 %v409_v30  ;;  %478 = vmatpush.msra.mxu0 %v409_v30 }
  0x7b   : > { %1915 = vmatpush.msra.mxu1 %v408_v31  ;;  %1916 = vmatpush.msra.mxu2 %v408_v31 }
  0x7c   : > { %1917 = vmatpush.msra.mxu3 %v408_v31  ;;  %485 = vmatmul.bf16.vlgmr.msra.gmra.mxu1 %v1865_v32 }
  0x7d   : > { %495 = vmatmul.bf16.vlgmr.msra.gmra.mxu2 %v1867_v33  ;;  %505 = vmatmul.bf16.vlgmr.msra.gmra.mxu3 %v1869_v34 }
  0x7e   : > { %479 = vmatpush.msra.mxu0 %v408_v31 }
  0x7f   : > { %480 = vmatmul.bf16.vlgmr.msra.gmra.mxu0 %v1864_v35 }
  0x8c   : > { %490 = vmatmul.bf16.gmra.mxu1 %v1866_v38 }
  0x8d   : > { %500 = vmatmul.bf16.gmra.mxu2 %v1868_v39  ;;  %510 = vmatmul.bf16.gmra.mxu3 %v456_v40 }
  0xf9   : > { %v486_v42 = vpop.f32.mrf.mxu1 }
  0xfa   : > { %v517_v43 = vadd.f32 %v486_v42, %v383_v41 }
  0xfc   : > { %531 = vst.msk [vmem:[#allocation2 + $0x10] sm:$0xff] %vm528_vm2, %v517_v43  ;;  %v481_v45 = vpop.f32.mrf.mxu0 }
  0xfd   : > { %v515_v46 = vadd.f32 %v481_v45, %v381_v44 }
  0xff   : > { %529 = vst.msk [vmem:[#allocation2] sm:$0xff] %vm528_vm2, %v515_v46 }
 0x100   : > { %v496_v50 = vpop.f32.mrf.mxu2  ;;  %v506_v51 = vpop.f32.mrf.mxu3 }
 0x101   : > { %v521_v52 = vadd.f32 %v496_v50, %v387_v47  ;;  %v525_v53 = vadd.f32 %v506_v51, %v391_v48  ;;  %v488_v54 = vpop.f32.mrf.mxu1 }
 0x102   : > { %v518_v55 = vadd.f32 %v488_v54, %v384_v49 }
 0x103   : > { %535 = vst.msk [vmem:[#allocation2 + $0x30] sm:$0xff] %vm528_vm2, %v521_v52 }
 0x104   : > { %539 = vst.msk [vmem:[#allocation2 + $0x50] sm:$0xff] %vm528_vm2, %v525_v53  ;;  %v483_v57 = vpop.f32.mrf.mxu0 }
 0x105   : > { %532 = vst.msk [vmem:[#allocation2 + $0x18] sm:$0xff] %vm528_vm2, %v518_v55  ;;  %v516_v58 = vadd.f32 %v483_v57, %v382_v56 }
 0x107   : > { %530 = vst.msk [vmem:[#allocation2 + $0x8] sm:$0xff] %vm528_vm2, %v516_v58 }
 0x108   : > { %v498_v62 = vpop.f32.mrf.mxu2  ;;  %v508_v63 = vpop.f32.mrf.mxu3 }
 0x109   : > { %v522_v0 = vadd.f32 %v498_v62, %v388_v59  ;;  %v526_v1 = vadd.f32 %v508_v63, %v392_v60  ;;  %v491_v2 = vpop.f32.mrf.mxu1 }
 0x10a   : > { %v519_v3 = vadd.f32 %v491_v2, %v385_v61 }
 0x10b   : > { %536 = vst.msk [vmem:[#allocation2 + $0x38] sm:$0xff] %vm528_vm2, %v522_v0 }
 0x10c   : > { %540 = vst.msk [vmem:[#allocation2 + $0x58] sm:$0xff] %vm528_vm2, %v526_v1 }
 0x10d   : > { %533 = vst.msk [vmem:[#allocation2 + $0x20] sm:$0xff] %vm528_vm2, %v519_v3 }
 0x110   : > { %v501_v7 = vpop.f32.mrf.mxu2  ;;  %v511_v8 = vpop.f32.mrf.mxu3 }
 0x111   : > { %v523_v9 = vadd.f32 %v501_v7, %v389_v4  ;;  %v527_v10 = vadd.f32 %v511_v8, %v393_v5  ;;  %v493_v11 = vpop.f32.mrf.mxu1 }
 0x112   : > { %v520_v12 = vadd.f32 %v493_v11, %v386_v6 }
 0x113   : > { %537 = vst.msk [vmem:[#allocation2 + $0x40] sm:$0xff] %vm528_vm2, %v523_v9 }
 0x114   : > { %541 = vst.msk [vmem:[#allocation2 + $0x60] sm:$0xff] %vm528_vm2, %v527_v10 }
 0x115   : > { %534 = vst.msk [vmem:[#allocation2 + $0x28] sm:$0xff] %vm528_vm2, %v520_v12 }
 0x118   : > { %v503_v14 = vpop.f32.mrf.mxu2  ;;  %v513_v15 = vpop.f32.mrf.mxu3 }
 0x119   : > { %v524_v16 = vadd.f32 %v503_v14, %v390_v13 }
 0x11b   : > { %538 = vst.msk [vmem:[#allocation2 + $0x48] sm:$0xff] %vm528_vm2, %v524_v16 }
 0x11c LB: >> { %s2424_s12 = sshll.u32 %s2235_s11, 3  ;;  %s577_s13 = sshra.s32 %s1832_s18, 7  ;;  %v2240_v19 = vmov 0   ;;  %s2235_s11 = sphi %s2418_s11, %s547_s11  }
 0x11d   : >> { %s553_s14 = sshra.s32 %s2424_s12, 3  ;;  %s1859_s17 = sshll.u32 %s577_s13, 3 }
 0x11e   : >> { %s1858_s15 = sshll.u32 %s553_s14, 2  ;;  %s580_s29 = scalar_lea.vmem %s3434_s2, %s1859_s17 }
 0x11f   : >> { %s557_s16 = scalar_lea.vmem %s2345_s8, %s1858_s15 [#allocation5]  ;;  %v2436_v21 = vld [vmem:[%s580_s29 + $0x20] sm:$0xff]  ;;  %v2458_v32 = vld [vmem:[%s580_s29 + $0x30] sm:$0xff]  ;;  %s549_s30 = scalar_lea.vmem [#allocation3], %s2424_s12 }
 0x120   : >> { %v558_v17 = vld [vmem:[%s557_s16] sm:$0xf]  ;;  %v2460_v33 = vld [vmem:[%s580_s29 + $0x10] sm:$0xff]  ;;  %s551_s21 = scalar_lea.vmem [#allocation4], %s2424_s12  ;;  %s547_s11 = sadd.s32 1, %s2235_s11  }
 0x121   : >> { %v559_v18 = vunpack.c.l.bf16 %v558_v17  ;;  %v2439_v23 = vld [vmem:[%s580_s29] sm:$0xff]  ;;  %p544_p12 = scmp.ge.s32.totalorder %s547_s11, 13  }
 0x122   : > { %p1860_p13 = scmp.ne.s32.totalorder (%p544_p12), %s2215_s20, 1 }
 0x123   : >> { %vm560_vm3 = vcmp.gt.f32.partialorder %v559_v18, 0.0 }
 0x124   : >> { %v2434_v20 = vsel %vm560_vm3, 1, %v2240_v19  ;;  %vm741_vm3 = vcmask 130112  }
 0x125   : >> { %v592_v22 = vperm.slane %v2434_v20, 0  ;;  %v562_v24 = vrot.slane %v2434_v20, 1  ;;  %v563_v30 = vrot.slane %v2434_v20, 2  ;;  %v564_v40 = vrot.slane %v2434_v20, 3 }
 0x126   : >> { %v565_v46 = vrot.slane %v2434_v20, 4  ;;  %v566_v56 = vrot.slane %v2434_v20, 5  ;;  %v568_v57 = vrot.slane %v2434_v20, 7  ;;  %v567_v2 = vrot.slane %v2434_v20, 6 }
 0x127   : >> { %vm2442_vm4 = vcmp.eq.s32.totalorder %v592_v22, 1  ;;  %vm569_vm5 = vcmp.ne.s32.totalorder %v562_v24, 0  ;;  %vm570_vm7 = vcmp.ne.s32.totalorder %v563_v30, 0  ;;  %vm571_vm9 = vcmp.ne.s32.totalorder %v564_v40, 0 }
 0x128   : >> { %v610_v26 = vsel %vm2442_vm4, %v2436_v21, -inf  ;;  %v608_v27 = vsel %vm2442_vm4, %v2439_v23, -inf  ;;  %v585_v28 = vsel %vm569_vm5, 1, %v2240_v19  ;;  %v611_v35 = vsel %vm2442_vm4, %v2458_v32, -inf }
 0x129   : >> { %644 = vmax.xlane.f32.xlu1 %v610_v26  ;;  %640 = vmax.xlane.f32.xlu0 %v608_v27  ;;  %v593_v29 = vperm.slane %v585_v28, 0  ;;  %v609_v36 = vsel %vm2442_vm4, %v2460_v33, -inf  ;;  %v586_v37 = vsel %vm570_vm7, 1, %v2240_v19  ;;  %v587_v45 = vsel %vm571_vm9, 1, %v2240_v19 }
 0x12a   : >> { %v594_v39 = vperm.slane %v586_v37, 0  ;;  %v595_v49 = vperm.slane %v587_v45, 0  ;;  %vm572_vm10 = vcmp.ne.s32.totalorder %v565_v46, 0  ;;  %vm575_vm13 = vcmp.ne.s32.totalorder %v568_v57, 0 }
 0x12b   : >> { %vm2454_vm6 = vcmp.eq.s32.totalorder %v593_v29, 1  ;;  %v588_v52 = vsel %vm572_vm10, 1, %v2240_v19  ;;  %v591_v60 = vsel %vm575_vm13, 1, %v2240_v19  ;;  %vm573_vm14 = vcmp.ne.s32.totalorder %v566_v56, 0 }
 0x12c   : >> { %v612_v34 = vsel %vm2454_vm6, %v2439_v23, -inf  ;;  %v613_v38 = vsel %vm2454_vm6, %v2460_v33, -inf  ;;  %v615_v41 = vsel %vm2454_vm6, %v2458_v32, -inf  ;;  %v614_v42 = vsel %vm2454_vm6, %v2436_v21, -inf }
 0x12d   : >> { %648 = vmax.xlane.f32.xlu2 %v612_v34  ;;  %vm2482_vm8 = vcmp.eq.s32.totalorder %v594_v39, 1  ;;  %vm2500_vm11 = vcmp.eq.s32.totalorder %v595_v49, 1  ;;  %v596_v55 = vperm.slane %v588_v52, 0  ;;  %v589_v63 = vsel %vm573_vm14, 1, %v2240_v19 }
 0x12e   : >> { %v616_v44 = vsel %vm2482_vm8, %v2439_v23, -inf  ;;  %v618_v47 = vsel %vm2482_vm8, %v2436_v21, -inf  ;;  %v617_v48 = vsel %vm2482_vm8, %v2460_v33, -inf  ;;  %v619_v50 = vsel %vm2482_vm8, %v2458_v32, -inf }
 0x12f   : >> { %v621_v53 = vsel %vm2500_vm11, %v2460_v33, -inf  ;;  %v620_v54 = vsel %vm2500_vm11, %v2439_v23, -inf  ;;  %v622_v58 = vsel %vm2500_vm11, %v2436_v21, -inf  ;;  %vm2516_vm12 = vcmp.eq.s32.totalorder %v596_v55, 1 }
 0x130   : >> { %v624_v61 = vsel %vm2516_vm12, %v2439_v23, -inf  ;;  %v623_v62 = vsel %vm2500_vm11, %v2458_v32, -inf  ;;  %v625_v0 = vsel %vm2516_vm12, %v2460_v33, -inf  ;;  %v597_v1 = vperm.slane %v589_v63, 0 }
 0x131   : >> { %646 = vmax.xlane.f32.xlu1 %v611_v35  ;;  %642 = vmax.xlane.f32.xlu0 %v609_v36  ;;  %v627_v3 = vsel %vm2516_vm12, %v2458_v32, -inf  ;;  %v626_v4 = vsel %vm2516_vm12, %v2436_v21, -inf  ;;  %vm574_vm0 = vcmp.ne.s32.totalorder %v567_v2, 0  ;;  %v599_v15 = vperm.slane %v591_v60, 0 }
 0x132   : >> { %vm2538_vm15 = vcmp.eq.s32.totalorder %v597_v1, 1  ;;  %v590_v7 = vsel %vm574_vm0, 1, %v2240_v19  ;;  %v816_v26 = vsel %vm2442_vm4, %v2439_v23, inf  ;;  %v818_v27 = vsel %vm2442_vm4, %v2436_v21, inf }
 0x133   : >> { %v628_v6 = vsel %vm2538_vm15, %v2439_v23, -inf  ;;  %v630_v8 = vsel %vm2538_vm15, %v2436_v21, -inf  ;;  %v629_v9 = vsel %vm2538_vm15, %v2460_v33, -inf  ;;  %v598_v10 = vperm.slane %v590_v7, 0 }
 0x134   : >> { %v631_v11 = vsel %vm2538_vm15, %v2458_v32, -inf  ;;  %vm2568_vm2 = vcmp.eq.s32.totalorder %v599_v15, 1  ;;  %v817_v28 = vsel %vm2442_vm4, %v2460_v33, inf  ;;  %v819_v29 = vsel %vm2442_vm4, %v2458_v32, inf }
 0x135   : >> { %650 = vmax.xlane.f32.xlu2 %v613_v38  ;;  %vm2555_vm1 = vcmp.eq.s32.totalorder %v598_v10, 1  ;;  %v636_v18 = vsel %vm2568_vm2, %v2439_v23, -inf  ;;  %v637_v20 = vsel %vm2568_vm2, %v2460_v33, -inf  ;;  %v639_v22 = vsel %vm2568_vm2, %v2458_v32, -inf }
 0x136   : >> { %v633_v13 = vsel %vm2555_vm1, %v2460_v33, -inf  ;;  %v632_v14 = vsel %vm2555_vm1, %v2439_v23, -inf  ;;  %v634_v16 = vsel %vm2555_vm1, %v2436_v21, -inf  ;;  %v635_v19 = vsel %vm2555_vm1, %v2458_v32, -inf }
 0x137   : >> { %v638_v24 = vsel %vm2568_vm2, %v2436_v21, -inf  ;;  %v821_v30 = vsel %vm2454_vm6, %v2460_v33, inf  ;;  %v820_v34 = vsel %vm2454_vm6, %v2439_v23, inf  ;;  %v822_v35 = vsel %vm2454_vm6, %v2436_v21, inf }
 0x138   : >> { %v824_v25 = vsel %vm2482_vm8, %v2439_v23, inf  ;;  %v823_v36 = vsel %vm2454_vm6, %v2458_v32, inf  ;;  %v825_v37 = vsel %vm2482_vm8, %v2460_v33, inf  ;;  %v827_v38 = vsel %vm2482_vm8, %v2458_v32, inf }
 0x139   : >> { %654 = vmax.xlane.f32.xlu1 %v615_v41  ;;  %652 = vmax.xlane.f32.xlu0 %v614_v42  ;;  %v826_v39 = vsel %vm2482_vm8, %v2436_v21, inf  ;;  %v828_v31 = vsel %vm2500_vm11, %v2439_v23, inf  ;;  %v736_v40 = vlaneseq  ;;  %v829_v45 = vsel %vm2500_vm11, %v2460_v33, inf }
 0x13a   : >> { %vm745_vm4 = vcmask 195712   ;;  %vm749_vm5 = vcmask 261312   ;;  %v833_v60 = vsel %vm2516_vm12, %v2460_v33, inf  ;;  %v834_v51 = vsel %vm2516_vm12, %v2436_v21, inf }
 0x13b   : >> { %v2632_v43 = vand.u32 127, %v736_v40  ;;  %v836_v10 = vsel %vm2538_vm15, %v2439_v23, inf  ;;  %vm800_vm6 = vcmask 1041409   ;;  %vm802_vm7 = vcmask 1042434  }
 0x13c   : >> { %vm804_vm8 = vcmask 1043459   ;;  %vm806_vm9 = vcmask 1044484   ;;  %vm808_vm10 = vcmask 1045509   ;;  %vm3441_vm13 = vcmask 261120  }
 0x13d   : >> { %656 = vmax.xlane.f32.xlu2 %v616_v44  ;;  %v830_v44 = vsel %vm2500_vm11, %v2436_v21, inf  ;;  %v2641_v49 = vadd.s32 4294967280, %v2632_v43 }
 0x141   : >> { %660 = vmax.xlane.f32.xlu1 %v618_v47  ;;  %658 = vmax.xlane.f32.xlu0 %v617_v48  ;;  %v2635_v47 = vadd.s32 4294967272, %v2632_v43  ;;  %v2638_v48 = vadd.s32 4294967288, %v2632_v43 }
 0x145   : >> { %662 = vmax.xlane.f32.xlu2 %v619_v50  ;;  %v832_v50 = vsel %vm2516_vm12, %v2439_v23, inf }
 0x149   : >> { %666 = vmax.xlane.f32.xlu1 %v621_v53  ;;  %664 = vmax.xlane.f32.xlu0 %v620_v54 }
 0x14d   : >> { %668 = vmax.xlane.f32.xlu2 %v622_v58  ;;  %v831_v58 = vsel %vm2500_vm11, %v2458_v32, inf  ;;  %vm810_vm11 = vcmask 1046534  }
 0x151   : >> { %672 = vmax.xlane.f32.xlu1 %v624_v61  ;;  %670 = vmax.xlane.f32.xlu0 %v623_v62 }
 0x155   : >> { %674 = vmax.xlane.f32.xlu2 %v625_v0 }
 0x159   : >> { %678 = vmax.xlane.f32.xlu1 %v627_v3  ;;  %676 = vmax.xlane.f32.xlu0 %v626_v4 }
 0x15d   : >> { %680 = vmax.xlane.f32.xlu2 %v628_v6 }
 0x161   : >> { %684 = vmax.xlane.f32.xlu1 %v630_v8  ;;  %682 = vmax.xlane.f32.xlu0 %v629_v9  ;;  %v837_v9 = vsel %vm2538_vm15, %v2460_v33, inf }
 0x165   : >> { %686 = vmax.xlane.f32.xlu2 %v631_v11 }
 0x169   : >> { %690 = vmax.xlane.f32.xlu1 %v633_v13  ;;  %688 = vmax.xlane.f32.xlu0 %v632_v14 }
 0x16d   : >> { %692 = vmax.xlane.f32.xlu2 %v634_v16  ;;  %v835_v16 = vsel %vm2516_vm12, %v2458_v32, inf  ;;  %vm812_vm12 = vcmask 1047559  }
 0x171   : >> { %696 = vmax.xlane.f32.xlu1 %v636_v18  ;;  %694 = vmax.xlane.f32.xlu0 %v635_v19 }
 0x175   : >> { %698 = vmax.xlane.f32.xlu2 %v637_v20  ;;  %v840_v20 = vsel %vm2555_vm1, %v2439_v23, inf }
 0x179   : >> { %702 = vmax.xlane.f32.xlu1 %v639_v22  ;;  %700 = vmax.xlane.f32.xlu0 %v638_v24  ;;  %v838_v22 = vsel %vm2538_vm15, %v2436_v21, inf }
 0x17d   : >> { %848 = vmin.xlane.f32.xlu2 %v816_v26  ;;  %v841_v26 = vsel %vm2555_vm1, %v2460_v33, inf }
 0x181   : >> { %852 = vmin.xlane.f32.xlu1 %v818_v27  ;;  %850 = vmin.xlane.f32.xlu0 %v817_v28  ;;  %v842_v28 = vsel %vm2555_vm1, %v2436_v21, inf }
 0x185   : >> { %854 = vmin.xlane.f32.xlu2 %v819_v29  ;;  %v839_v29 = vsel %vm2538_vm15, %v2458_v32, inf }
 0x189   : >> { %858 = vmin.xlane.f32.xlu1 %v821_v30  ;;  %856 = vmin.xlane.f32.xlu0 %v820_v34  ;;  %v844_v34 = vsel %vm2568_vm2, %v2439_v23, inf }
 0x18d   : >> { %860 = vmin.xlane.f32.xlu2 %v822_v35 }
 0x191   : >> { %864 = vmin.xlane.f32.xlu1 %v824_v25  ;;  %862 = vmin.xlane.f32.xlu0 %v823_v36  ;;  %v843_v36 = vsel %vm2555_vm1, %v2458_v32, inf }
 0x195   : >> { %866 = vmin.xlane.f32.xlu2 %v825_v37  ;;  %v845_v37 = vsel %vm2568_vm2, %v2460_v33, inf }
 0x199   : >> { %870 = vmin.xlane.f32.xlu1 %v827_v38  ;;  %868 = vmin.xlane.f32.xlu0 %v826_v39  ;;  %v846_v38 = vsel %vm2568_vm2, %v2436_v21, inf }
 0x19c   : >> { %v645_v41 = vpop.xlane.xlu1 %644  ;;  %v641_v42 = vpop.xlane.xlu0 %640 }
 0x19d   : >> { %872 = vmin.xlane.f32.xlu2 %v828_v31  ;;  %v738_v54 = vperm.slane %v641_v42, %v2632_v43  ;;  %v744_v57 = vperm.slane %v645_v41, %v2641_v49  ;;  %v847_v31 = vsel %vm2568_vm2, %v2458_v32, inf }
 0x1a0   : >> { %v649_v46 = vpop.xlane.xlu2 %648 }
 0x1a1   : >> { %876 = vmin.xlane.f32.xlu1 %v830_v44  ;;  %874 = vmin.xlane.f32.xlu0 %v829_v45  ;;  %v751_v2 = vperm.slane %v649_v46, %v2632_v43 }
 0x1a4   : >> { %v647_v52 = vpop.xlane.xlu1 %646  ;;  %v643_v53 = vpop.xlane.xlu0 %642 }
 0x1a5   : >> { %v748_v55 = vperm.slane %v647_v52, %v2635_v47  ;;  %v740_v56 = vperm.slane %v643_v53, %v2638_v48  ;;  %880 = vmin.xlane.f32.xlu2 %v832_v50 }
 0x1a7   : >> { %v742_v61 = vsel %vm741_vm3, %v740_v56, %v738_v54 }
 0x1a8   : >> { %v746_v62 = vsel %vm745_vm4, %v744_v57, %v742_v61  ;;  %v651_v63 = vpop.xlane.xlu2 %650 }
 0x1a9   : >> { %v750_v0 = vsel %vm749_vm5, %v748_v55, %v746_v62  ;;  %878 = vmin.xlane.f32.xlu1 %v831_v58  ;;  %882 = vmin.xlane.f32.xlu0 %v833_v60  ;;  %v752_v1 = vperm.slane %v651_v63, %v2638_v48 }
 0x1ab   : >> { %v753_v8 = vsel %vm741_vm3, %v752_v1, %v751_v2 }
 0x1ac   : >> { %v655_v3 = vpop.xlane.xlu1 %654  ;;  %v653_v4 = vpop.xlane.xlu0 %652 }
 0x1ad   : >> { %v756_v6 = vperm.slane %v655_v3, %v2635_v47  ;;  %v754_v7 = vperm.slane %v653_v4, %v2641_v49  ;;  %884 = vmin.xlane.f32.xlu2 %v834_v51 }
 0x1af   : >> { %v755_v11 = vsel %vm745_vm4, %v754_v7, %v753_v8 }
 0x1b0   : >> { %v757_v13 = vsel %vm749_vm5, %v756_v6, %v755_v11  ;;  %v657_v14 = vpop.xlane.xlu2 %656 }
 0x1b1   : >> { %890 = vmin.xlane.f32.xlu1 %v837_v9  ;;  %888 = vmin.xlane.f32.xlu0 %v836_v10  ;;  %v2676_v15 = vsel %vm800_vm6, %v757_v13, %v750_v0  ;;  %v758_v45 = vperm.slane %v657_v14, %v2632_v43 }
 0x1b4   : >> { %v661_v18 = vpop.xlane.xlu1 %660  ;;  %v659_v19 = vpop.xlane.xlu0 %658 }
 0x1b5   : >> { %886 = vmin.xlane.f32.xlu2 %v835_v16  ;;  %v759_v46 = vperm.slane %v659_v19, %v2638_v48  ;;  %v761_v53 = vperm.slane %v661_v18, %v2641_v49 }
 0x1b7   : >> { %v760_v32 = vsel %vm741_vm3, %v759_v46, %v758_v45 }
 0x1b8   : >> { %v663_v24 = vpop.xlane.xlu2 %662  ;;  %v762_v63 = vsel %vm745_vm4, %v761_v53, %v760_v32 }
 0x1b9   : >> { %896 = vmin.xlane.f32.xlu1 %v840_v20  ;;  %892 = vmin.xlane.f32.xlu0 %v838_v22  ;;  %v763_v17 = vperm.slane %v663_v24, %v2635_v47 }
 0x1bb   : >> { %v764_v1 = vsel %vm749_vm5, %v763_v17, %v762_v63 }
 0x1bc   : >> { %v667_v59 = vpop.xlane.xlu1 %666  ;;  %v665_v27 = vpop.xlane.xlu0 %664  ;;  %v803_v22 = vsel %vm802_vm7, %v764_v1, %v2676_v15 }
 0x1bd   : >> { %898 = vmin.xlane.f32.xlu2 %v841_v26  ;;  %v766_v54 = vperm.slane %v667_v59, %v2638_v48  ;;  %v765_v55 = vperm.slane %v665_v27, %v2632_v43 }
 0x1bf   : >> { %v767_v51 = vsel %vm741_vm3, %v766_v54, %v765_v55 }
 0x1c0   : >> { %v669_v30 = vpop.xlane.xlu2 %668 }
 0x1c1   : >> { %900 = vmin.xlane.f32.xlu1 %v842_v28  ;;  %894 = vmin.xlane.f32.xlu0 %v839_v29  ;;  %v768_v0 = vperm.slane %v669_v30, %v2641_v49 }
 0x1c3   : >> { %v769_v16 = vsel %vm745_vm4, %v768_v0, %v767_v51 }
 0x1c4   : >> { %v673_v35 = vpop.xlane.xlu1 %672  ;;  %v671_v25 = vpop.xlane.xlu0 %670 }
 0x1c5   : >> { %904 = vmin.xlane.f32.xlu2 %v844_v34  ;;  %v772_v21 = vperm.slane %v673_v35, %v2632_v43  ;;  %v770_v2 = vperm.slane %v671_v25, %v2635_v47 }
 0x1c7   : >> { %v771_v20 = vsel %vm749_vm5, %v770_v2, %v769_v16 }
 0x1c8   : >> { %v675_v5 = vpop.xlane.xlu2 %674  ;;  %v805_v35 = vsel %vm804_vm8, %v771_v20, %v803_v22 }
 0x1c9   : >> { %902 = vmin.xlane.f32.xlu1 %v843_v36  ;;  %906 = vmin.xlane.f32.xlu0 %v845_v37  ;;  %v773_v50 = vperm.slane %v675_v5, %v2638_v48 }
 0x1cb   : >> { %v774_v57 = vsel %vm741_vm3, %v773_v50, %v772_v21 }
 0x1cc   : >> { %v679_v39 = vpop.xlane.xlu1 %678  ;;  %v677_v23 = vpop.xlane.xlu0 %676 }
 0x1cd   : >> { %908 = vmin.xlane.f32.xlu2 %v846_v38  ;;  %v775_v56 = vperm.slane %v677_v23, %v2641_v49  ;;  %v777_v3 = vperm.slane %v679_v39, %v2635_v47  ;;  %v550_v38 = vld [vmem:[%s549_s30] sm:$0xff] }
 0x1cf   : >> { %v776_v4 = vsel %vm745_vm4, %v775_v56, %v774_v57 }
 0x1d0   : >> { %v681_v12 = vpop.xlane.xlu2 %680  ;;  %v778_v24 = vsel %vm749_vm5, %v777_v3, %v776_v4 }
 0x1d1   : >> { %910 = vmin.xlane.f32.xlu0 %v847_v31  ;;  %v779_v58 = vperm.slane %v681_v12, %v2632_v43  ;;  %v807_v37 = vsel %vm806_vm9, %v778_v24, %v805_v35 }
 0x1d4   : >> { %v685_v40 = vpop.xlane.xlu1 %684  ;;  %v683_v41 = vpop.xlane.xlu0 %682 }
 0x1d5   : >> { %v780_v60 = vperm.slane %v683_v41, %v2638_v48  ;;  %v782_v6 = vperm.slane %v685_v40, %v2641_v49 }
 0x1d7   : >> { %v781_v9 = vsel %vm741_vm3, %v780_v60, %v779_v58 }
 0x1d8   : >> { %v687_v42 = vpop.xlane.xlu2 %686  ;;  %v783_v26 = vsel %vm745_vm4, %v782_v6, %v781_v9 }
 0x1d9   : >> { %v784_v10 = vperm.slane %v687_v42, %v2635_v47 }
 0x1db   : >> { %v785_v27 = vsel %vm749_vm5, %v784_v10, %v783_v26 }
 0x1dc   : >> { %v691_v33 = vpop.xlane.xlu1 %690  ;;  %v689_v44 = vpop.xlane.xlu0 %688  ;;  %v809_v5 = vsel %vm808_vm10, %v785_v27, %v807_v37 }
 0x1dd   : >> { %v787_v7 = vperm.slane %v691_v33, %v2638_v48  ;;  %v786_v8 = vperm.slane %v689_v44, %v2632_v43 }
 0x1df   : >> { %v788_v59 = vsel %vm741_vm3, %v787_v7, %v786_v8 }
 0x1e0   : >> { %v693_v52 = vpop.xlane.xlu2 %692 }
 0x1e1   : >> { %v789_v11 = vperm.slane %v693_v52, %v2641_v49 }
 0x1e3   : >> { %v790_v28 = vsel %vm745_vm4, %v789_v11, %v788_v59 }
 0x1e4   : >> { %v697_v61 = vpop.xlane.xlu1 %696  ;;  %v695_v62 = vpop.xlane.xlu0 %694 }
 0x1e5   : >> { %v793_v13 = vperm.slane %v697_v61, %v2632_v43  ;;  %v791_v18 = vperm.slane %v695_v62, %v2635_v47 }
 0x1e7   : >> { %v792_v15 = vsel %vm749_vm5, %v791_v18, %v790_v28 }
 0x1e8   : >> { %v699_v14 = vpop.xlane.xlu2 %698  ;;  %v811_v23 = vsel %vm810_vm11, %v792_v15, %v809_v5 }
 0x1e9   : >> { %v794_v19 = vperm.slane %v699_v14, %v2638_v48 }
 0x1eb   : >> { %v795_v29 = vsel %vm741_vm3, %v794_v19, %v793_v13 }
 0x1ec   : >> { %v703_v30 = vpop.xlane.xlu1 %702  ;;  %v701_v34 = vpop.xlane.xlu0 %700 }
 0x1ed   : >> { %v798_v25 = vperm.slane %v703_v30, %v2635_v47  ;;  %v796_v36 = vperm.slane %v701_v34, %v2641_v49 }
 0x1ef   : >> { %v797_v39 = vsel %vm745_vm4, %v796_v36, %v795_v29 }
 0x1f0   : >> { %v799_v31 = vsel %vm749_vm5, %v798_v25, %v797_v39  ;;  %v849_v12 = vpop.xlane.xlu2 %848 }
 0x1f1   : >> { %v813_v40 = vsel %vm812_vm12, %v799_v31, %v811_v23  ;;  %v944_v42 = vperm.slane %v849_v12, %v2632_v43 }
 0x1f2   : >> { %v815_v41 = vmax.f32 %v550_v38, %v813_v40 }
 0x1f4   : >> { %1010 = vst.msk [vmem:[%s549_s30] sm:$0xff] %vm3441_vm13, %v815_v41  ;;  %v853_v33 = vpop.xlane.xlu1 %852  ;;  %v851_v44 = vpop.xlane.xlu0 %850 }
 0x1f5   : >> { %v947_v45 = vperm.slane %v853_v33, %v2641_v49  ;;  %v945_v46 = vperm.slane %v851_v44, %v2638_v48 }
 0x1f7   : >> { %v946_v21 = vsel %vm741_vm3, %v945_v46, %v944_v42 }
 0x1f8   : >> { %v948_v50 = vsel %vm745_vm4, %v947_v45, %v946_v21  ;;  %v855_v52 = vpop.xlane.xlu2 %854 }
 0x1f9   : >> { %v949_v53 = vperm.slane %v855_v52, %v2635_v47 }
 0x1fb   : >> { %v950_v32 = vsel %vm749_vm5, %v949_v53, %v948_v50 }
 0x1fc   : >> { %v859_v17 = vpop.xlane.xlu1 %858  ;;  %v857_v54 = vpop.xlane.xlu0 %856 }
 0x1fd   : >> { %v952_v56 = vperm.slane %v859_v17, %v2638_v48  ;;  %v951_v57 = vperm.slane %v857_v54, %v2632_v43 }
 0x1ff   : >> { %v953_v62 = vsel %vm741_vm3, %v952_v56, %v951_v57 }
 0x200   : >> { %v861_v55 = vpop.xlane.xlu2 %860 }
 0x201   : >> { %v954_v58 = vperm.slane %v861_v55, %v2641_v49 }
 0x203   : >> { %v955_v0 = vsel %vm745_vm4, %v954_v58, %v953_v62 }
 0x204   : >> { %v865_v60 = vpop.xlane.xlu1 %864  ;;  %v863_v61 = vpop.xlane.xlu0 %862 }
 0x205   : >> { %v956_v63 = vperm.slane %v863_v61, %v2635_v47  ;;  %v958_v24 = vperm.slane %v865_v60, %v2632_v43 }
 0x207   : >> { %v957_v1 = vsel %vm749_vm5, %v956_v63, %v955_v0 }
 0x208   : >> { %v1000_v51 = vsel %vm800_vm6, %v957_v1, %v950_v32  ;;  %v867_v2 = vpop.xlane.xlu2 %866 }
 0x209   : >> { %v959_v26 = vperm.slane %v867_v2, %v2638_v48 }
 0x20b   : >> { %v960_v34 = vsel %vm741_vm3, %v959_v26, %v958_v24 }
 0x20c   : >> { %v871_v3 = vpop.xlane.xlu1 %870  ;;  %v869_v4 = vpop.xlane.xlu0 %868 }
 0x20d   : >> { %v961_v28 = vperm.slane %v869_v4, %v2641_v49  ;;  %v963_v15 = vperm.slane %v871_v3, %v2635_v47 }
 0x20f   : >> { %v962_v25 = vsel %vm745_vm4, %v961_v28, %v960_v34 }
 0x210   : >> { %v873_v6 = vpop.xlane.xlu2 %872  ;;  %v964_v46 = vsel %vm749_vm5, %v963_v15, %v962_v25 }
 0x211   : >> { %v965_v29 = vperm.slane %v873_v6, %v2632_v43  ;;  %v1001_v0 = vsel %vm802_vm7, %v964_v46, %v1000_v51  ;;  %v552_v51 = vld [vmem:[%s551_s21] sm:$0xff] }
 0x214   : >> { %v877_v7 = vpop.xlane.xlu1 %876  ;;  %v875_v8 = vpop.xlane.xlu0 %874 }
 0x215   : >> { %v966_v30 = vperm.slane %v875_v8, %v2638_v48  ;;  %v968_v36 = vperm.slane %v877_v7, %v2641_v49 }
 0x217   : >> { %v967_v37 = vsel %vm741_vm3, %v966_v30, %v965_v29 }
 0x218   : >> { %v881_v9 = vpop.xlane.xlu2 %880  ;;  %v969_v21 = vsel %vm745_vm4, %v968_v36, %v967_v37 }
 0x219   : >> { %v972_v5 = vperm.slane %v881_v9, %v2632_v43 }
 0x21c   : >> { %v879_v10 = vpop.xlane.xlu1 %878  ;;  %v883_v11 = vpop.xlane.xlu0 %882 }
 0x21d   : >> { %v970_v38 = vperm.slane %v879_v10, %v2635_v47  ;;  %v973_v39 = vperm.slane %v883_v11, %v2638_v48 }
 0x21f   : >> { %v971_v53 = vsel %vm749_vm5, %v970_v38, %v969_v21  ;;  %v974_v32 = vsel %vm741_vm3, %v973_v39, %v972_v5 }
 0x220   : >> { %v885_v13 = vpop.xlane.xlu2 %884  ;;  %v1002_v3 = vsel %vm804_vm8, %v971_v53, %v1001_v0 }
 0x221   : >> { %v975_v40 = vperm.slane %v885_v13, %v2641_v49 }
 0x223   : >> { %v976_v56 = vsel %vm745_vm4, %v975_v40, %v974_v32 }
 0x224   : >> { %v891_v14 = vpop.xlane.xlu1 %890  ;;  %v889_v16 = vpop.xlane.xlu0 %888 }
 0x225   : >> { %v980_v41 = vperm.slane %v891_v14, %v2638_v48  ;;  %v979_v42 = vperm.slane %v889_v16, %v2632_v43 }
 0x227   : >> { %v981_v57 = vsel %vm741_vm3, %v980_v41, %v979_v42 }
 0x228   : >> { %v887_v18 = vpop.xlane.xlu2 %886 }
 0x229   : >> { %v977_v44 = vperm.slane %v887_v18, %v2635_v47 }
 0x22b   : >> { %v978_v61 = vsel %vm749_vm5, %v977_v44, %v976_v56 }
 0x22c   : >> { %v897_v19 = vpop.xlane.xlu1 %896  ;;  %v893_v20 = vpop.xlane.xlu0 %892  ;;  %v1003_v6 = vsel %vm806_vm9, %v978_v61, %v1002_v3 }
 0x22d   : >> { %v986_v23 = vperm.slane %v897_v19, %v2632_v43  ;;  %v982_v45 = vperm.slane %v893_v20, %v2641_v49 }
 0x22f   : >> { %v983_v62 = vsel %vm745_vm4, %v982_v45, %v981_v57 }
 0x230   : >> { %v899_v22 = vpop.xlane.xlu2 %898 }
 0x231   : >> { %v987_v31 = vperm.slane %v899_v22, %v2638_v48 }
 0x233   : >> { %v988_v17 = vsel %vm741_vm3, %v987_v31, %v986_v23 }
 0x234   : >> { %v901_v59 = vpop.xlane.xlu1 %900  ;;  %v895_v27 = vpop.xlane.xlu0 %894 }
 0x235   : >> { %v989_v50 = vperm.slane %v901_v59, %v2641_v49  ;;  %v984_v52 = vperm.slane %v895_v27, %v2635_v47 }
 0x237   : >> { %v990_v1 = vsel %vm745_vm4, %v989_v50, %v988_v17  ;;  %v985_v2 = vsel %vm749_vm5, %v984_v52, %v983_v62 }
 0x238   : >> { %v905_v35 = vpop.xlane.xlu2 %904  ;;  %v1004_v8 = vsel %vm808_vm10, %v985_v2, %v1003_v6 }
 0x239   : >> { %v993_v58 = vperm.slane %v905_v35, %v2632_v43 }
 0x23c   : >> { %v907_v12 = vpop.xlane.xlu0 %906  ;;  %v903_v33 = vpop.xlane.xlu1 %902 }
 0x23d   : >> { %v991_v54 = vperm.slane %v903_v33, %v2635_v47  ;;  %v994_v60 = vperm.slane %v907_v12, %v2638_v48 }
 0x23f   : >> { %v992_v4 = vsel %vm749_vm5, %v991_v54, %v990_v1  ;;  %v995_v48 = vsel %vm741_vm3, %v994_v60, %v993_v58 }
 0x240   : >> { %v909_v55 = vpop.xlane.xlu2 %908  ;;  %v1005_v9 = vsel %vm810_vm11, %v992_v4, %v1004_v8 }
 0x241   : >> { %v996_v63 = vperm.slane %v909_v55, %v2641_v49 }
 0x243   : >> { %v997_v49 = vsel %vm745_vm4, %v996_v63, %v995_v48 }
 0x244   : >> { %v911_v43 = vpop.xlane.xlu0 %910 }
 0x245   : >> { %v998_v7 = vperm.slane %v911_v43, %v2635_v47 }
 0x247   : >> { %v999_v10 = vsel %vm749_vm5, %v998_v7, %v997_v49  ;;  %546 = sbr.rel (!%p544_p12) target bundleno = 284 (0x11c), region = 136 }
 0x248   : >> { %v1006_v11 = vsel %vm812_vm12, %v999_v10, %v1005_v9 }
 0x249   : >> { %v1008_v13 = vmin.f32 %v552_v51, %v1006_v11 }
 0x24b   : >> { %1011 = vst.msk [vmem:[%s551_s21] sm:$0xff] %vm3441_vm13, %v1008_v13 }
 0x24c   : > { %1015 = sbr.rel (%p1860_p13) target bundleno = 1070 (0x42e), region = 96 }
 0x251   : > { %v2831_v47 = vld [vmem:[#allocation2 + $0x48] sm:$0xff]  ;;  %v2833_v14 = vld [vmem:[#allocation2 + $0x10] sm:$0xff]  ;;  %v2835_v16 = vld [vmem:[#allocation2] sm:$0xff]  ;;  %v2241_v18 = vmov 32   ;;  %v2242_v34 = vmov 0   ;;  %s2243_s20 = smov 64  }
 0x252   : > { %2043 = vset.pattern.permute.xlu2 %v2241_v18  ;;  %2042 = vset.pattern.permute.xlu1 %v2241_v18  ;;  %v1051_v19 = vmax.f32 %v2831_v47, 1.0  ;;  %v1044_v20 = vmax.f32 %v2833_v14, 1.0  ;;  %v1042_v22 = vmax.f32 %v2835_v16, 1.0  ;;  %v2840_v24 = vld [vmem:[#allocation2 + $0x30] sm:$0xff]  ;;  %v2842_v26 = vld [vmem:[#allocation2 + $0x28] sm:$0xff]  ;;  %vm1038_vm14 = vcmp.gt.f32.partialorder %v2831_v47, 0.0 }
 0x253   : > { %2041 = vset.pattern.permute.xlu0 %v2241_v18  ;;  %v2844_v59 = vld [vmem:[#allocation2 + $0x8] sm:$0xff]  ;;  %v1048_v27 = vmax.f32 %v2840_v24, 1.0  ;;  %v1047_v28 = vmax.f32 %v2842_v26, 1.0  ;;  %vm1034_vm15 = vcmp.gt.f32.partialorder %v2842_v26, 0.0  ;;  %v2851_v30 = vld [vmem:[#allocation2 + $0x50] sm:$0xff]  ;;  %v1337_v35 = vsel %vm1038_vm14, 1, %v2242_v34 }
 0x254   : > { %1102 = vperm.xlu2 %2043, %v1051_v19   ;;  %1067 = vperm.xlu1 %2042, %v1044_v20   ;;  %3458 = vst [vmem:[#allocation6_spill] sm:$0xff] %v2844_v59  ;;  %v1043_v29 = vmax.f32 %v2844_v59, 1.0  ;;  %v1333_v15 = vsel %vm1034_vm15, 1, %v2242_v34  ;;  %v1052_v25 = vmax.f32 %v2851_v30, 1.0  ;;  %v2854_v36 = vld [vmem:[#allocation2 + $0x18] sm:$0xff]  ;;  %v2863_v31 = vld [vmem:[#allocation2 + $0x40] sm:$0xff] }
 0x255   : > { %1057 = vperm.xlu0 %2041, %v1042_v22   ;;  %v2856_v37 = vld [vmem:[#allocation2 + $0x58] sm:$0xff]  ;;  %v1045_v38 = vmax.f32 %v2854_v36, 1.0  ;;  %vm1039_vm0 = vcmp.gt.f32.partialorder %v2851_v30, 0.0  ;;  %vm1035_vm1 = vcmp.gt.f32.partialorder %v2840_v24, 0.0  ;;  %v1050_v12 = vmax.f32 %v2863_v31, 1.0  ;;  %v2868_v42 = vld [vmem:[#allocation2 + $0x20] sm:$0xff] }
 0x256   : > { %v2858_v5 = vld [vmem:[#allocation2 + $0x38] sm:$0xff]  ;;  %v1053_v39 = vmax.f32 %v2856_v37, 1.0  ;;  %v1338_v40 = vsel %vm1039_vm0, 1, %v2242_v34  ;;  %v1334_v41 = vsel %vm1035_vm1, 1, %v2242_v34  ;;  %3459 = vst [vmem:[#allocation7_spill] sm:$0xff] %v2868_v42  ;;  %vm1031_vm2 = vcmp.gt.f32.partialorder %v2833_v14, 0.0 }
 0x257   : > { %v1049_v23 = vmax.f32 %v2858_v5, 1.0  ;;  %v2871_v33 = vld [vmem:[#allocation2 + $0x60] sm:$0xff]  ;;  %v1046_v44 = vmax.f32 %v2868_v42, 1.0  ;;  %v1330_v45 = vsel %vm1031_vm2, 1, %v2242_v34  ;;  %vm1040_vm3 = vcmp.gt.f32.partialorder %v2856_v37, 0.0  ;;  %v1415_v3 = vld [vmem:[#allocation4 + $0x48] sm:$0xff] }
 0x258   : > { %3460 = vst [vmem:[#allocation8_spill] sm:$0xff] %v2871_v33  ;;  %v1054_v46 = vmax.f32 %v2871_v33, 1.0  ;;  %vm1029_vm4 = vcmp.gt.f32.partialorder %v2835_v16, 0.0  ;;  %vm1036_vm5 = vcmp.gt.f32.partialorder %v2858_v5, 0.0  ;;  %v1339_v21 = vsel %vm1040_vm3, 1, %v2242_v34  ;;  %v1320_v4 = vld [vmem:[#allocation3 + $0x28] sm:$0xff] }
 0x259   : > { %v1328_v50 = vsel %vm1029_vm4, 1, %v2242_v34  ;;  %v1335_v52 = vsel %vm1036_vm5, 1, %v2242_v34  ;;  %vm1037_vm6 = vcmp.gt.f32.partialorder %v2863_v31, 0.0  ;;  %vm1041_vm7 = vcmp.gt.f32.partialorder %v2871_v33, 0.0  ;;  %v1411_v43 = vld [vmem:[#allocation4 + $0x28] sm:$0xff]  ;;  %v1324_v6 = vld [vmem:[#allocation3 + $0x48] sm:$0xff] }
 0x25a   : > { %vm1032_vm8 = vcmp.gt.f32.partialorder %v2854_v36, 0.0  ;;  %v1336_v53 = vsel %vm1037_vm6, 1, %v2242_v34  ;;  %v1340_v32 = vsel %vm1041_vm7, 1, %v2242_v34  ;;  %vm1033_vm9 = vcmp.gt.f32.partialorder %v2868_v42, 0.0  ;;  %s2244_s8 = smov 32   ;;  %v1325_v20 = vld [vmem:[#allocation3 + $0x50] sm:$0xff] }
 0x25b   : > { %v1331_v17 = vsel %vm1032_vm8, 1, %v2242_v34  ;;  %vm1030_vm10 = vcmp.gt.f32.partialorder %v2844_v59, 0.0  ;;  %v1332_v54 = vsel %vm1033_vm9, 1, %v2242_v34  ;;  %s2245_s18 = smov 96  }
 0x25c   : > { %1087 = vperm.xlu2 %2043, %v1048_v27   ;;  %1082 = vperm.xlu1 %2042, %v1047_v28   ;;  %v1329_v55 = vsel %vm1030_vm10, 1, %v2242_v34  ;;  %v1416_v27 = vld [vmem:[#allocation4 + $0x50] sm:$0xff] }
 0x25d   : > { %1062 = vperm.xlu0 %2041, %v1043_v29   ;;  %v1321_v29 = vld [vmem:[#allocation3 + $0x30] sm:$0xff]  ;;  %v1412_v34 = vld [vmem:[#allocation4 + $0x30] sm:$0xff] }
 0x264   : > { %1369 = vperm.xlu2 %2043, %v1337_v35   ;;  %1357 = vperm.xlu1 %2042, %v1333_v15  }
 0x265   : > { %1107 = vperm.xlu0 %2041, %v1052_v25  }
 0x26c   : > { %1072 = vperm.xlu2 %2043, %v1045_v38   ;;  %1112 = vperm.xlu1 %2042, %v1053_v39  }
 0x26d   : > { %1092 = vperm.xlu0 %2041, %v1049_v23  }
 0x274   : > { %1097 = vperm.xlu2 %2043, %v1050_v12   ;;  %1372 = vperm.xlu1 %2042, %v1338_v40  }
 0x275   : > { %1360 = vperm.xlu0 %2041, %v1334_v41  }
 0x27c   : > { %1077 = vperm.xlu2 %2043, %v1046_v44   ;;  %1348 = vperm.xlu1 %2042, %v1330_v45  }
 0x27d   : > { %1117 = vperm.xlu0 %2041, %v1054_v46  }
 0x284   : > { %1375 = vperm.xlu1 %2042, %v1339_v21   ;;  %1342 = vperm.xlu2 %2043, %v1328_v50  }
 0x285   : > { %1363 = vperm.xlu0 %2041, %v1335_v52  }
 0x28c   : > { %1366 = vperm.xlu1 %2042, %v1336_v53   ;;  %1378 = vperm.xlu2 %2043, %v1340_v32  }
 0x28d   : > { %1351 = vperm.xlu0 %2041, %v1331_v17  }
 0x294   : > { %1354 = vperm.xlu1 %2042, %v1332_v54  }
 0x295   : > { %1345 = vperm.xlu0 %2041, %v1329_v55  }
 0x2ae   : > { %v2883_v56 = vpop.permute.xlu2 %1102 }
 0x2af   : > { %2135 = vrcp.f32 %v2883_v56  ;;  %vm1260_vm0 = vweird.f32 %v2883_v56  ;;  %v1266_v53 = vand.u32 2147483648, %v2883_v56 }
 0x2b5   : > { %v2909_v18 = vpop.eup %2135 }
 0x2b6   : > { %v2885_v57 = vpop.permute.xlu2 %1087  ;;  %v1256_v19 = vmul.f32 %v2909_v18, %v2883_v56  ;;  %vm1261_vm1 = vweird.f32 %v2909_v18 }
 0x2b7   : > { %2137 = vrcp.f32 %v2885_v57  ;;  %vm2939_vm2 = vmor %vm1260_vm0, %vm1261_vm1 }
 0x2b8   : > { %v1257_v15 = vsub.f32 1.0, %v1256_v19 }
 0x2ba   : > { %v1258_v45 = vmul.f32 %v2909_v18, %v1257_v15  ;;  %v1408_v15 = vld [vmem:[#allocation4 + $0x10] sm:$0xff] }
 0x2bc   : > { %v2937_v17 = vadd.f32 %v2909_v18, %v1258_v45 }
 0x2bd   : > { %v2913_v22 = vpop.eup %2137 }
 0x2be   : > { %v1370_v61 = vpop.permute.xlu2 %1369  ;;  %v1211_v39 = vmul.f32 %v2913_v22, %v2885_v57 }
 0x2bf   : > { %vm1389_vm11 = vcmp.eq.s32.totalorder %v1370_v61, 1 }
 0x2c0   : > { %v1428_v48 = vsel %vm1389_vm11, %v1415_v3, 0.0  ;;  %v1402_v49 = vsel %vm1389_vm11, %v1324_v6, 0.0  ;;  %v1212_v46 = vsub.f32 1.0, %v1211_v39  ;;  %v2953_v6 = vor.u32 1.1754944e-38, %v1266_v53  ;;  %v1413_v39 = vld [vmem:[#allocation4 + $0x38] sm:$0xff] }
 0x2c2   : > { %v1213_v55 = vmul.f32 %v2913_v22, %v1212_v46 }
 0x2c6   : > { %v2887_v58 = vpop.permute.xlu1 %1067  ;;  %v2895_v0 = vpop.permute.xlu2 %1072 }
 0x2c7   : > { %v2889_v60 = vpop.permute.xlu0 %1057  ;;  %v1159_v19 = vand.u32 2147483647, %v2887_v58  ;;  %v1174_v33 = vand.u32 2147483647, %v2895_v0  ;;  %vm1155_vm7 = vweird.f32 %v2887_v58  ;;  %vm1170_vm11 = vweird.f32 %v2895_v0 }
 0x2c9   : > { %vm3003_vm9 = vcmp.eq.f32.partialorder %v1159_v19, 8.507059e+37 }
 0x2ce   : > { %v2891_v62 = vpop.permute.xlu1 %1082  ;;  %v2900_v10 = vpop.permute.xlu2 %1097 }
 0x2cf   : > { %v2893_v63 = vpop.permute.xlu0 %1062 }
 0x2d6   : > { %v1358_v1 = vpop.permute.xlu1 %1357  ;;  %v2915_v25 = vpop.permute.xlu2 %1077 }
 0x2d7   : > { %v2897_v2 = vpop.permute.xlu0 %1107  ;;  %vm1385_vm12 = vcmp.eq.s32.totalorder %v1358_v1, 1 }
 0x2d8   : > { %v1424_v7 = vsel %vm1385_vm12, %v1411_v43, 0.0  ;;  %v1398_v8 = vsel %vm1385_vm12, %v1320_v4, 0.0 }
 0x2d9   : > { %v2049_v51 = vpack.i.bf16 %v1428_v48, %v1424_v7  ;;  %v2044_v9 = vpack.i.bf16 %v1402_v49, %v1398_v8 }
 0x2db   : > { %2050 = vrot.lane.b32.xlu0 %v2049_v51, %s2243_s20  ;;  %2045 = vrot.lane.b32.xlu2 %v2044_v9, %s2244_s8  ;;  %v2967_v9 = vadd.f32 %v2913_v22, %v1213_v55 }
 0x2de   : > { %v2903_v11 = vpop.permute.xlu1 %1112  ;;  %v2948_v3 = vpop.permute.xlu2 %1342 }
 0x2df   : > { %v2906_v13 = vpop.permute.xlu0 %1092  ;;  %vm1380_vm3 = vcmp.eq.s32.totalorder %v2948_v3, 1 }
 0x2e0   : > { %2139 = vrcp.f32 %v2906_v13  ;;  %v1236_v19 = vand.u32 2147483648, %v2906_v13 }
 0x2e1   : > { %2141 = vrcp.f32 %v2887_v58 }
 0x2e2   : > { %2143 = vrcp.f32 %v2895_v0 }
 0x2e3   : > { %2145 = vrcp.f32 %v2900_v10 }
 0x2e4   : > { %2147 = vrcp.f32 %v2891_v62 }
 0x2e5   : > { %2149 = vrcp.f32 %v2889_v60 }
 0x2e6   : > { %v1373_v28 = vpop.permute.xlu1 %1372  ;;  %v2925_v21 = vpop.eup %2139  ;;  %2151 = vrcp.f32 %v2897_v2 }
 0x2e7   : > { %vm1390_vm14 = vcmp.eq.s32.totalorder %v1373_v28, 1  ;;  %v1361_v35 = vpop.permute.xlu0 %1360  ;;  %v2930_v52 = vpop.eup %2141  ;;  %v1226_v61 = vmul.f32 %v2925_v21, %v2906_v13  ;;  %v1326_v28 = vld [vmem:[#allocation3 + $0x58] sm:$0xff]  ;;  %vm1231_vm10 = vweird.f32 %v2925_v21  ;;  %2153 = vrcp.f32 %v2903_v11 }
 0x2e8   : > { %v1403_v38 = vsel %vm1390_vm14, %v1325_v20, 0.0  ;;  %v1429_v23 = vsel %vm1390_vm14, %v1416_v27, 0.0  ;;  %vm1386_vm15 = vcmp.eq.s32.totalorder %v1361_v35, 1  ;;  %v1151_v1 = vmul.f32 %v2930_v52, %v2887_v58  ;;  %v2950_v4 = vpop.eup %2143  ;;  %v1315_v27 = vld [vmem:[#allocation3] sm:$0xff] }
 0x2e9   : > { %v1425_v12 = vsel %vm1386_vm15, %v1412_v34, 0.0  ;;  %v1399_v40 = vsel %vm1386_vm15, %v1321_v29, 0.0  ;;  %v2955_v48 = vpop.eup %2145  ;;  %v1227_v20 = vsub.f32 1.0, %v1226_v61  ;;  %v1176_v29 = vand.u32 2147483648, %v2895_v0 }
 0x2ea   : > { %v2059_v41 = vpack.i.bf16 %v1429_v23, %v1425_v12  ;;  %v2054_v44 = vpack.i.bf16 %v1403_v38, %v1399_v40  ;;  %v2964_v51 = vpop.eup %2147  ;;  %v1152_v34 = vsub.f32 1.0, %v1151_v1  ;;  %v1161_v35 = vand.u32 2147483648, %v2887_v58  ;;  %v1317_v40 = vld [vmem:[#allocation3 + $0x10] sm:$0xff] }
 0x2eb   : > { %v2975_v23 = vmul.f32 %v2950_v4, %v2895_v0  ;;  %v1241_v12 = vmul.f32 %v2955_v48, %v2900_v10  ;;  %v1196_v45 = vmul.f32 %v2964_v51, %v2891_v62  ;;  %v1393_v46 = vsel %vm1380_vm3, %v1315_v27, 0.0  ;;  %v2987_v49 = vpop.eup %2149  ;;  %v1418_v0 = vld [vmem:[#allocation4 + $0x60] sm:$0xff] }
 0x2ec   : > { %2060 = vrot.lane.b32.xlu0 %v2059_v41, %s2243_s20  ;;  %2055 = vrot.lane.b32.xlu2 %v2054_v44, %s2244_s8  ;;  %v1322_v41 = vld [vmem:[#allocation3 + $0x38] sm:$0xff]  ;;  %v1228_v55 = vmul.f32 %v2925_v21, %v1227_v20  ;;  %v1153_v7 = vmul.f32 %v2930_v52, %v1152_v34  ;;  %v2992_v27 = vor.u32 1.1754944e-38, %v1176_v29  ;;  %vm1156_vm8 = vweird.f32 %v2930_v52 }
 0x2ed   : > { %v1167_v20 = vsub.f32 1.0, %v2975_v23  ;;  %v1197_v34 = vsub.f32 1.0, %v1196_v45  ;;  %v1249_v23 = vand.u32 2147483647, %v2900_v10  ;;  %vm1171_vm12 = vweird.f32 %v2950_v4 }
 0x2ee   : > { %v1349_v50 = vpop.permute.xlu1 %1348  ;;  %vm1245_vm14 = vweird.f32 %v2900_v10  ;;  %vm1230_vm15 = vweird.f32 %v2906_v13 }
 0x2ef   : > { %v2934_v32 = vpop.permute.xlu0 %1117  ;;  %vm1382_vm4 = vcmp.eq.s32.totalorder %v1349_v50, 1  ;;  %v1417_v50 = vld [vmem:[#allocation4 + $0x58] sm:$0xff]  ;;  %vm3029_vm1 = vmor %vm1230_vm15, %vm1231_vm10  ;;  %vm1216_vm10 = vweird.f32 %v2913_v22 }
 0x2f0   : > { %v1421_v61 = vsel %vm1382_vm4, %v1408_v15, 0.0  ;;  %v1395_v43 = vsel %vm1382_vm4, %v1317_v40, 0.0  ;;  %v2998_v15 = vor.u32 1.1754944e-38, %v1161_v35  ;;  %v1323_v35 = vld [vmem:[#allocation3 + $0x40] sm:$0xff]  ;;  %v1406_v40 = vld [vmem:[#allocation4] sm:$0xff]  ;;  %2155 = vrcp.f32 %v2934_v32 }
 0x2f1   : > { %2157 = vrcp.f32 %v2915_v25 }
 0x2f2   : > { %2159 = vrcp.f32 %v2893_v63 }
 0x2f6   : > { %v1376_v38 = vpop.permute.xlu1 %1375 }
 0x2f7   : > { %vm1391_vm5 = vcmp.eq.s32.totalorder %v1376_v38, 1  ;;  %v1364_v44 = vpop.permute.xlu0 %1363  ;;  %v1419_v38 = vsel %vm1380_vm3, %v1406_v40, 0.0  ;;  %vm3054_vm3 = vmor %vm1155_vm7, %vm1156_vm8  ;;  %v1206_v40 = vand.u32 2147483648, %v2891_v62  ;;  %vm1201_vm7 = vweird.f32 %v2964_v51 }
 0x2f8   : > { %v1404_v53 = vsel %vm1391_vm5, %v1326_v28, 0.0  ;;  %vm1387_vm6 = vcmp.eq.s32.totalorder %v1364_v44, 1  ;;  %v1318_v44 = vld [vmem:[#allocation3 + $0x18] sm:$0xff]  ;;  %vm1246_vm8 = vweird.f32 %v2955_v48 }
 0x2f9   : > { %v2074_v1 = vpack.i.bf16 %v1393_v46, %v1404_v53  ;;  %v1426_v8 = vsel %vm1387_vm6, %v1413_v39, 0.0  ;;  %v1400_v42 = vsel %vm1387_vm6, %v1322_v41, 0.0  ;;  %v1229_v39 = vadd.f32 %v2925_v21, %v1228_v55  ;;  %vm3097_vm6 = vmor %vm1245_vm14, %vm1246_vm8 }
 0x2fa   : > { %v2069_v59 = vpack.i.bf16 %v1426_v8, %v1421_v61  ;;  %v2064_v28 = vpack.i.bf16 %v1400_v42, %v1395_v43  ;;  %v3001_v8 = vpop.eup %2151  ;;  %v3009_v42 = vmul.f32 %v2987_v49, %v2889_v60  ;;  %v1242_v43 = vsub.f32 1.0, %v1241_v12  ;;  %vm3124_vm14 = vmor %vm1170_vm11, %vm1171_vm12 }
 0x2fb   : > { %2075 = vrot.lane.b32.xlu1 %v2074_v1, %s2244_s8  ;;  %v1234_v12 = vand.u32 2147483647, %v2906_v13  ;;  %v1198_v46 = vmul.f32 %v2964_v51, %v1197_v34  ;;  %v1271_v53 = vmul.f32 %v3001_v8, %v2897_v2  ;;  %v3467_v34 = vand.u32 2147483647, %v2883_v56  ;;  %v3065_v55 = vpop.eup %2153 }
 0x2fc   : > { %2070 = vrot.lane.b32.xlu0 %v2069_v59, %s2243_s20  ;;  %2065 = vrot.lane.b32.xlu2 %v2064_v28, %s2244_s8  ;;  %v1154_v59 = vadd.f32 %v2930_v52, %v1153_v7  ;;  %v1430_v7 = vsel %vm1391_vm5, %v1417_v50, 0.0  ;;  %v1243_v13 = vmul.f32 %v2955_v48, %v1242_v43  ;;  %v1233_v28 = vsel %vm3029_vm1, %v2925_v21, %v1229_v39 }
 0x2fd   : > { %vm3043_vm5 = vcmp.eq.f32.partialorder %v3467_v34, 8.507059e+37  ;;  %v1168_v43 = vmul.f32 %v2950_v4, %v1167_v20  ;;  %v1237_v21 = vor.u32 1.1754944e-38, %v1236_v19  ;;  %v2079_v56 = vpack.i.bf16 %v1419_v38, %v1430_v7  ;;  %v1414_v7 = vld [vmem:[#allocation4 + $0x40] sm:$0xff] }
 0x2fe   : > { %v1367_v41 = vpop.permute.xlu1 %1366  ;;  %vm1235_vm15 = vcmp.eq.f32.partialorder %v1234_v12, 8.507059e+37  ;;  %v1158_v20 = vsel %vm3054_vm3, %v2930_v52, %v1154_v59  ;;  %v1199_v58 = vadd.f32 %v2964_v51, %v1198_v46  ;;  %v1272_v19 = vsub.f32 1.0, %v1271_v53  ;;  %v1327_v46 = vld [vmem:[#allocation3 + $0x60] sm:$0xff]  ;;  %v1316_v53 = vld [vmem:[#allocation3 + $0x8] sm:$0xff] }
 0x2ff   : > { %vm1388_vm0 = vcmp.eq.s32.totalorder %v1367_v41, 1  ;;  %v1352_v45 = vpop.permute.xlu0 %1351  ;;  %v1238_v38 = vsel %vm1235_vm15, %v1237_v21, %v1233_v28  ;;  %v1244_v12 = vadd.f32 %v2955_v48, %v1243_v13  ;;  %vm3072_vm1 = vcmp.eq.f32.partialorder %v1249_v23, 8.507059e+37 }
 0x300   : > { %v1401_v61 = vsel %vm1388_vm0, %v1323_v35, 0.0  ;;  %vm1383_vm4 = vcmp.eq.s32.totalorder %v1352_v45, 1  ;;  %v1251_v35 = vand.u32 2147483648, %v2900_v10  ;;  %vm1200_vm3 = vweird.f32 %v2891_v62 }
 0x301   : > { %v1396_v1 = vsel %vm1383_vm4, %v1318_v44, 0.0  ;;  %v3060_v44 = vpop.permute.xlu2 %1378  ;;  %v1169_v52 = vadd.f32 %v2950_v4, %v1168_v43  ;;  %v1204_v59 = vand.u32 2147483647, %v2891_v62  ;;  %v1163_v13 = vsel %vm3003_vm9, %v2998_v15, %v1158_v20  ;;  %vm3086_vm15 = vmor %vm1200_vm3, %vm1201_vm7 }
 0x302   : > { %v2084_v39 = vpack.i.bf16 %v1401_v61, %v1396_v1  ;;  %v1409_v61 = vld [vmem:[#allocation4 + $0x18] sm:$0xff]  ;;  %vm1392_vm13 = vcmp.eq.s32.totalorder %v3060_v44, 1  ;;  %v1207_v28 = vor.u32 1.1754944e-38, %v1206_v40  ;;  %v1427_v34 = vsel %vm1388_vm0, %v1414_v7, 0.0 }
 0x303   : > { %v1422_v43 = vsel %vm1383_vm4, %v1409_v61, 0.0  ;;  %v1239_v3 = vmul.f32 %v1238_v38, %v2858_v5  ;;  %v1273_v29 = vmul.f32 %v3001_v8, %v1272_v19  ;;  %v1286_v21 = vmul.f32 %v3065_v55, %v2903_v11 }
 0x304   : > { %2080 = vrot.lane.b32.xlu0 %v2079_v56, %s2243_s20  ;;  %2085 = vrot.lane.b32.xlu2 %v2084_v39, %s2244_s8  ;;  %v1203_v41 = vsel %vm3086_vm15, %v2964_v51, %v1199_v58  ;;  %v3478_v5 = vand.u32 2147483647, %v2885_v57  ;;  %v1405_v10 = vsel %vm1392_vm13, %v1327_v46, 0.0  ;;  %v1164_v39 = vmul.f32 %v1163_v13, %v2833_v14  ;;  %v1410_v51 = vld [vmem:[#allocation4 + $0x20] sm:$0xff] }
 0x305   : > { %v1248_v40 = vsel %vm3097_vm6, %v2955_v48, %v1244_v12  ;;  %v1252_v20 = vor.u32 1.1754944e-38, %v1251_v35  ;;  %vm1205_vm4 = vcmp.eq.f32.partialorder %v1204_v59, 8.507059e+37  ;;  %v2089_v58 = vpack.i.bf16 %v1427_v34, %v1422_v43  ;;  %v1407_v12 = vld [vmem:[#allocation4 + $0x8] sm:$0xff] }
 0x306   : > { %vm3109_vm0 = vcmp.eq.f32.partialorder %v3478_v5, 8.507059e+37  ;;  %v2114_v7 = vpack.i.bf16 %v1239_v3, %v1164_v39  ;;  %v1173_v14 = vsel %vm3124_vm14, %v2950_v4, %v1169_v52  ;;  %v1208_v48 = vsel %vm1205_vm4, %v1207_v28, %v1203_v41  ;;  %v1633_v39 = vld [vmem:[%s3435_s3 + $0x18] sm:$0xff] }
 0x307   : > { %v1346_v62 = vpop.permute.xlu0 %1345  ;;  %v1274_v61 = vadd.f32 %v3001_v8, %v1273_v29  ;;  %vm1276_vm6 = vweird.f32 %v3001_v8  ;;  %v1287_v38 = vsub.f32 1.0, %v1286_v21  ;;  %v1253_v35 = vsel %vm3072_vm1, %v1252_v20, %v1248_v40  ;;  %v1355_v29 = vpop.permute.xlu1 %1354 }
 0x308   : > { %vm1381_vm9 = vcmp.eq.s32.totalorder %v1346_v62, 1  ;;  %vm3483_vm11 = vweird.f32 %v2885_v57  ;;  %vm1175_vm7 = vcmp.eq.f32.partialorder %v1174_v33, 8.507059e+37  ;;  %v1122_v52 = vsub.f32 1.0, %v3009_v42 }
 0x309   : > { %v1394_v56 = vsel %vm1381_vm9, %v1316_v53, 0.0  ;;  %vm3142_vm12 = vmor %vm3483_vm11, %vm1216_vm10  ;;  %v1281_v59 = vand.u32 2147483648, %v2897_v2  ;;  %v3486_v1 = vsel %vm2939_vm2, %v2909_v18, %v2937_v17  ;;  %vm1275_vm10 = vweird.f32 %v2897_v2 }
 0x30a   : > { %v2094_v19 = vpack.i.bf16 %v1394_v56, %v1405_v10  ;;  %v1268_v46 = vsel %vm3043_vm5, %v2953_v6, %v3486_v1  ;;  %v1279_v33 = vand.u32 2147483647, %v2897_v2  ;;  %v1178_v42 = vsel %vm1175_vm7, %v2992_v27, %v1173_v14  ;;  %vm3168_vm2 = vmor %vm1275_vm10, %vm1276_vm6  ;;  %v3183_v27 = vpop.eup %2155 }
 0x30b   : > { %v1209_v53 = vmul.f32 %v1208_v48, %v2842_v26  ;;  %v3487_v13 = vand.u32 2147483648, %v2885_v57  ;;  %v1420_v17 = vsel %vm1381_vm9, %v1407_v12, 0.0  ;;  %v1254_v2 = vmul.f32 %v1253_v35, %v2863_v31  ;;  %v3198_v3 = vpop.eup %2157 }
 0x30c   : > { %2090 = vrot.lane.b32.xlu0 %v2089_v58, %s2243_s20  ;;  %2095 = vrot.lane.b32.xlu1 %v2094_v19, %s2244_s8  ;;  %v1288_v54 = vmul.f32 %v3065_v55, %v1287_v38  ;;  %v1269_v6 = vmul.f32 %v1268_v46, %v2831_v47  ;;  %v1218_v26 = vsel %vm3142_vm12, %v2913_v22, %v2967_v9  ;;  %v1282_v50 = vor.u32 1.1754944e-38, %v1281_v59  ;;  %v3207_v10 = vpop.eup %2159  ;;  %v1319_v19 = vld [vmem:[#allocation3 + $0x20] sm:$0xff] }
 0x30d   : > { %2115 = vrot.lane.b32.xlu2 %v2114_v7, %s2245_s18  ;;  %v1222_v23 = vor.u32 1.1754944e-38, %v3487_v13  ;;  %v1278_v57 = vsel %vm3168_vm2, %v3001_v8, %v1274_v61  ;;  %v1431_v31 = vsel %vm1392_vm13, %v1418_v0, 0.0  ;;  %v1179_v28 = vmul.f32 %v1178_v42, %v2854_v36 }
 0x30e   : > { %v1123_v47 = vmul.f32 %v2987_v49, %v1122_v52  ;;  %vm1280_vm5 = vcmp.eq.f32.partialorder %v1279_v33, 8.507059e+37  ;;  %v2099_v34 = vpack.i.bf16 %v1420_v17, %v1431_v31  ;;  %v2104_v43 = vpack.i.bf16 %v1269_v6, %v1209_v53 }
 0x30f   : > { %v2124_v22 = vpack.i.bf16 %v1254_v2, %v1179_v28  ;;  %v1283_v9 = vsel %vm1280_vm5, %v1282_v50, %v1278_v57  ;;  %v1289_v62 = vadd.f32 %v3065_v55, %v1288_v54  ;;  %vm1291_vm8 = vweird.f32 %v3065_v55  ;;  %v3494_v57 = vld [vmem:[#allocation8_spill] sm:$0xff] }
 0x310   : > { %v1301_v8 = vmul.f32 %v3183_v27, %v2934_v32  ;;  %v1223_v44 = vsel %vm3109_vm0, %v1222_v23, %v1218_v26  ;;  %vm1126_vm13 = vweird.f32 %v2987_v49  ;;  %v1296_v15 = vand.u32 2147483648, %v2903_v11 }
 0x311   : > { %v1124_v21 = vadd.f32 %v2987_v49, %v1123_v47  ;;  %vm1290_vm1 = vweird.f32 %v2903_v11  ;;  %v1294_v41 = vand.u32 2147483647, %v2903_v11  ;;  %v1284_v5 = vmul.f32 %v1283_v9, %v2851_v30  ;;  %v3495_v47 = vld [vmem:[#allocation7_spill] sm:$0xff]  ;;  %v1644_v9 = vld [vmem:[%s3435_s3 + $0x70] sm:$0xff] }
 0x312   : > { %vm1125_vm3 = vweird.f32 %v2889_v60  ;;  %v1129_v45 = vand.u32 2147483647, %v2889_v60  ;;  %v1131_v56 = vand.u32 2147483648, %v2889_v60  ;;  %vm3214_vm15 = vmor %vm1290_vm1, %vm1291_vm8  ;;  %v1224_v40 = vmul.f32 %v1223_v44, %v2840_v24  ;;  %v1642_v44 = vld [vmem:[%s3435_s3 + $0x60] sm:$0xff] }
 0x313   : > { %v1181_v11 = vmul.f32 %v3198_v3, %v2915_v25  ;;  %v1302_v30 = vsub.f32 1.0, %v1301_v8  ;;  %vm1384_vm9 = vcmp.eq.s32.totalorder %v1355_v29, 1  ;;  %v1293_v20 = vsel %vm3214_vm15, %v3065_v55, %v1289_v62  ;;  %vm3226_vm0 = vmor %vm1125_vm3, %vm1126_vm13  ;;  %v1643_v8 = vld [vmem:[%s3435_s3 + $0x68] sm:$0xff] }
 0x314   : > { %2100 = vrot.lane.b32.xlu0 %v2099_v34, %s2243_s20  ;;  %2105 = vrot.lane.b32.xlu1 %v2104_v43, %s2245_s18  ;;  %v1297_v58 = vor.u32 1.1754944e-38, %v1296_v15  ;;  %v1136_v24 = vmul.f32 %v3207_v10, %v2893_v63  ;;  %vm1295_vm14 = vcmp.eq.f32.partialorder %v1294_v41, 8.507059e+37  ;;  %v2109_v7 = vpack.i.bf16 %v1284_v5, %v1224_v40  ;;  %v3496_v43 = vld [vmem:[#allocation6_spill] sm:$0xff]  ;;  %v1640_v15 = vld [vmem:[%s3435_s3 + $0x50] sm:$0xff]  ;;  %v1639_v29 = vld [vmem:[%s3435_s3 + $0x48] sm:$0xff] }
 0x315   : > { %2125 = vrot.lane.b32.xlu2 %v2124_v22, %s2245_s18  ;;  %v1128_v14 = vsel %vm3226_vm0, %v2987_v49, %v1124_v21  ;;  %v1132_v48 = vor.u32 1.1754944e-38, %v1131_v56  ;;  %v1423_v61 = vsel %vm1384_vm9, %v1410_v51, 0.0  ;;  %vm1130_vm4 = vcmp.eq.f32.partialorder %v1129_v45, 8.507059e+37  ;;  %v1638_v21 = vld [vmem:[%s3435_s3 + $0x40] sm:$0xff]  ;;  %v1637_v41 = vld [vmem:[%s3435_s3 + $0x38] sm:$0xff]  ;;  %v1636_v5 = vld [vmem:[%s3435_s3 + $0x30] sm:$0xff] }
 0x316   : > { %v1298_v55 = vsel %vm1295_vm14, %v1297_v58, %v1293_v20  ;;  %v1182_v38 = vsub.f32 1.0, %v1181_v11  ;;  %v1303_v12 = vmul.f32 %v3183_v27, %v1302_v30  ;;  %v1397_v35 = vsel %vm1384_vm9, %v1319_v19, 0.0  ;;  %v1634_v56 = vld [vmem:[%s3435_s3 + $0x20] sm:$0xff]  ;;  %v1632_v40 = vld [vmem:[%s3435_s3 + $0x10] sm:$0xff]  ;;  %v1631_v11 = vld [vmem:[%s3435_s3 + $0x8] sm:$0xff] }
 0x317   : > { %v1133_v4 = vsel %vm1130_vm4, %v1132_v48, %v1128_v14  ;;  %v1137_v52 = vsub.f32 1.0, %v1136_v24  ;;  %v1299_v59 = vmul.f32 %v1298_v55, %v2856_v37  ;;  %vm1306_vm6 = vweird.f32 %v3183_v27  ;;  %v1630_v51 = vld [vmem:[%s3435_s3] sm:$0xff] }
 0x318   : > { %v1183_v49 = vmul.f32 %v3198_v3, %v1182_v38  ;;  %v1134_v1 = vmul.f32 %v1133_v4, %v2835_v16  ;;  %v1304_v46 = vadd.f32 %v3183_v27, %v1303_v12  ;;  %v1311_v33 = vand.u32 2147483648, %v2934_v32 }
 0x319   : > { %v1138_v0 = vmul.f32 %v3207_v10, %v1137_v52  ;;  %vm1305_vm11 = vweird.f32 %v2934_v32  ;;  %v1309_v53 = vand.u32 2147483647, %v2934_v32  ;;  %vm1186_vm7 = vweird.f32 %v3198_v3 }
 0x31a   : > { %v2119_v42 = vpack.i.bf16 %v1134_v1, %v1299_v59  ;;  %vm1307_vm12 = vmor %vm1305_vm11, %vm1306_vm6  ;;  %v1184_v37 = vadd.f32 %v3198_v3, %v1183_v49  ;;  %vm1185_vm10 = vweird.f32 %v2915_v25  ;;  %v1191_v13 = vand.u32 2147483648, %v2915_v25 }
 0x31b   : > { %v1308_v16 = vsel %vm1307_vm12, %v3183_v27, %v1304_v46  ;;  %v1312_v23 = vor.u32 1.1754944e-38, %v1311_v33  ;;  %v1139_v18 = vadd.f32 %v3207_v10, %v1138_v0  ;;  %vm1141_vm2 = vweird.f32 %v3207_v10  ;;  %vm1187_vm8 = vmor %vm1185_vm10, %vm1186_vm7 }
 0x31c   : > { %1505 = vrot.lane.b32.xlu0 %v1423_v61, %s2243_s20  ;;  %2110 = vrot.lane.b32.xlu1 %v2109_v7, %s2245_s18  ;;  %v1189_v32 = vand.u32 2147483647, %v2915_v25  ;;  %vm1310_vm5 = vcmp.eq.f32.partialorder %v1309_v53, 8.507059e+37  ;;  %v1146_v17 = vand.u32 2147483648, %v2893_v63  ;;  %vm1140_vm13 = vweird.f32 %v2893_v63  ;;  %v2161_v61 = vld [vmem:[#allocation2 + $0x10] sm:$0xff] }
 0x31d   : > { %1453 = vrot.lane.b32.xlu2 %v1397_v35, %s2244_s8  ;;  %v1313_v2 = vsel %vm1310_vm5, %v1312_v23, %v1308_v16  ;;  %v1144_v54 = vand.u32 2147483647, %v2893_v63  ;;  %v1188_v6 = vsel %vm1187_vm8, %v3198_v3, %v1184_v37  ;;  %vm1142_vm1 = vmor %vm1140_vm13, %vm1141_vm2  ;;  %v1192_v26 = vor.u32 1.1754944e-38, %v1191_v13  ;;  %v1645_v63 = vld [vmem:[%s3435_s3 + $0x78] sm:$0xff] }
 0x31e   : > { %vm1190_vm3 = vcmp.eq.f32.partialorder %v1189_v32, 8.507059e+37  ;;  %v1314_v27 = vmul.f32 %v1313_v2, %v3494_v57  ;;  %v1143_v50 = vsel %vm1142_vm1, %v3207_v10, %v1139_v18  ;;  %v1147_v31 = vor.u32 1.1754944e-38, %v1146_v17  ;;  %1918 = vmatpush.msra.mxu1 %v1645_v63  ;;  %1919 = vmatpush.msra.mxu2 %v1645_v63  ;;  %v1641_v3 = vld [vmem:[%s3435_s3 + $0x58] sm:$0xff]  ;;  %v1635_v10 = vld [vmem:[%s3435_s3 + $0x28] sm:$0xff] }
 0x31f   : > { %v1193_v25 = vsel %vm1190_vm3, %v1192_v26, %v1188_v6  ;;  %vm1145_vm15 = vcmp.eq.f32.partialorder %v1144_v54, 8.507059e+37  ;;  %1920 = vmatpush.msra.mxu3 %v1645_v63  ;;  %1650 = vmatpush.msra.mxu0 %v1645_v63  ;;  %vm1616_vm9 = vcmask 785408   ;;  %vm3497_vm0 = vcmask 261120   ;;  %v2162_v17 = vld [vmem:[#allocation2 + $0x48] sm:$0xff] }
 0x320   : > { %v1148_v28 = vsel %vm1145_vm15, %v1147_v31, %v1143_v50  ;;  %v1194_v34 = vmul.f32 %v1193_v25, %v3495_v47  ;;  %1921 = vmatpush.msra.mxu1 %v1644_v9  ;;  %1922 = vmatpush.msra.mxu2 %v1644_v9  ;;  %vm1602_vm14 = vcmask 523264   ;;  %vm3498_vm4 = vmmov %vm3497_vm0  ;;  %v2163_v54 = vld [vmem:[#allocation2 + $0x28] sm:$0xff] }
 0x321   : > { %v1149_v22 = vmul.f32 %v1148_v28, %v3496_v43  ;;  %1923 = vmatpush.msra.mxu3 %v1644_v9  ;;  %1651 = vmatpush.msra.mxu0 %v1644_v9  ;;  %vm3499_vm6 = vmmov %vm3497_vm0  ;;  %v2165_v9 = vld [vmem:[#allocation2 + $0x30] sm:$0xff] }
 0x322   : > { %1924 = vmatpush.msra.mxu1 %v1643_v8  ;;  %1925 = vmatpush.msra.mxu2 %v1643_v8  ;;  %vm3500_vm11 = vmmov %vm3497_vm0 }
 0x323   : > { %v2129_v62 = vpack.i.bf16 %v1194_v34, %v1149_v22  ;;  %1926 = vmatpush.msra.mxu3 %v1643_v8  ;;  %1652 = vmatpush.msra.mxu0 %v1643_v8  ;;  %v2164_v22 = vld [vmem:[#allocation2 + $0x50] sm:$0xff]  ;;  %vm3501_vm12 = vmmov %vm3497_vm0 }
 0x324   : > { %2120 = vrot.lane.b32.xlu1 %v2119_v42, %s2245_s18  ;;  %1927 = vmatpush.msra.mxu1 %v1642_v44  ;;  %vm3502_vm7 = vmmov %vm3497_vm0 }
 0x325   : > { %1928 = vmatpush.msra.mxu2 %v1642_v44  ;;  %1929 = vmatpush.msra.mxu3 %v1642_v44  ;;  %vm3503_vm10 = vmmov %vm3497_vm0 }
 0x326   : > { %1653 = vmatpush.msra.mxu0 %v1642_v44  ;;  %1930 = vmatpush.msra.mxu1 %v1641_v3  ;;  %vm3504_vm2 = vmmov %vm3497_vm0 }
 0x327   : > { %1931 = vmatpush.msra.mxu2 %v1641_v3  ;;  %1932 = vmatpush.msra.mxu3 %v1641_v3  ;;  %vm3505_vm5 = vmmov %vm3497_vm0 }
 0x328   : > { %1654 = vmatpush.msra.mxu0 %v1641_v3  ;;  %1933 = vmatpush.msra.mxu1 %v1640_v15  ;;  %vm3506_vm8 = vmmov %vm3497_vm0 }
 0x329   : > { %1934 = vmatpush.msra.mxu2 %v1640_v15  ;;  %1935 = vmatpush.msra.mxu3 %v1640_v15  ;;  %vm3507_vm13 = vmmov %vm3497_vm0 }
 0x32a   : > { %1655 = vmatpush.msra.mxu0 %v1640_v15  ;;  %1936 = vmatpush.msra.mxu1 %v1639_v29  ;;  %vm3508_vm1 = vmmov %vm3497_vm0 }
 0x32b   : > { %1937 = vmatpush.msra.mxu2 %v1639_v29  ;;  %1938 = vmatpush.msra.mxu3 %v1639_v29  ;;  %vm3509_vm3 = vmmov %vm3497_vm0 }
 0x32c   : > { %1573 = vrot.lane.b32.xlu1 %v1314_v27, %s2245_s18  ;;  %1656 = vmatpush.msra.mxu0 %v1639_v29 }
 0x32d   : > { %1939 = vmatpush.msra.mxu1 %v1638_v21  ;;  %1940 = vmatpush.msra.mxu2 %v1638_v21 }
 0x32e   : > { %1941 = vmatpush.msra.mxu3 %v1638_v21  ;;  %1657 = vmatpush.msra.mxu0 %v1638_v21 }
 0x32f   : > { %1942 = vmatpush.msra.mxu1 %v1637_v41  ;;  %1943 = vmatpush.msra.mxu2 %v1637_v41 }
 0x330   : > { %1944 = vmatpush.msra.mxu3 %v1637_v41  ;;  %1658 = vmatpush.msra.mxu0 %v1637_v41 }
 0x331   : > { %1945 = vmatpush.msra.mxu1 %v1636_v5  ;;  %1946 = vmatpush.msra.mxu2 %v1636_v5 }
 0x332   : > { %1947 = vmatpush.msra.mxu3 %v1636_v5  ;;  %1659 = vmatpush.msra.mxu0 %v1636_v5 }
 0x333   : > { %1948 = vmatpush.msra.mxu1 %v1635_v10  ;;  %1949 = vmatpush.msra.mxu2 %v1635_v10 }
 0x334   : > { %2130 = vrot.lane.b32.xlu1 %v2129_v62, %s2245_s18  ;;  %1950 = vmatpush.msra.mxu3 %v1635_v10 }
 0x335   : > { %v3300_v45 = vpop.permute.xlu2 %2045  ;;  %1660 = vmatpush.msra.mxu0 %v1635_v10  ;;  %1951 = vmatpush.msra.mxu1 %v1634_v56 }
 0x336   : > { %1952 = vmatpush.msra.mxu2 %v1634_v56  ;;  %1953 = vmatpush.msra.mxu3 %v1634_v56  ;;  %v2048_v16 = vunpack.i.h.bf16 %v3300_v45  ;;  %v2047_v13 = vunpack.i.l.bf16 %v3300_v45 }
 0x337   : > { %1661 = vmatpush.msra.mxu0 %v1634_v56  ;;  %1954 = vmatpush.msra.mxu1 %v1633_v39 }
 0x338   : > { %1955 = vmatpush.msra.mxu2 %v1633_v39  ;;  %1956 = vmatpush.msra.mxu3 %v1633_v39  ;;  %v1598_v2 = vsel %vm3499_vm6, %v2162_v17, %v2048_v16 }
 0x339   : > { %1662 = vmatpush.msra.mxu0 %v1633_v39  ;;  %1957 = vmatpush.msra.mxu1 %v1632_v40 }
 0x33a   : > { %1958 = vmatpush.msra.mxu2 %v1632_v40  ;;  %1959 = vmatpush.msra.mxu3 %v1632_v40 }
 0x33b   : > { %1663 = vmatpush.msra.mxu0 %v1632_v40  ;;  %1960 = vmatpush.msra.mxu1 %v1631_v11  ;;  %v2166_v40 = vld [vmem:[#allocation2 + $0x38] sm:$0xff] }
 0x33c   : > { %1961 = vmatpush.msra.mxu2 %v1631_v11  ;;  %1962 = vmatpush.msra.mxu3 %v1631_v11 }
 0x33d   : > { %1664 = vmatpush.msra.mxu0 %v1631_v11  ;;  %1963 = vmatpush.msra.mxu1 %v1630_v51 }
 0x33e   : > { %1964 = vmatpush.msra.mxu2 %v1630_v51  ;;  %1965 = vmatpush.msra.mxu3 %v1630_v51 }
 0x33f   : > { %1665 = vmatpush.msra.mxu0 %v1630_v51 }
 0x346   : > { %v3314_v30 = vpop.permute.xlu2 %2055 }
 0x347   : > { %v2058_v25 = vunpack.i.h.bf16 %v3314_v30  ;;  %v2057_v28 = vunpack.i.l.bf16 %v3314_v30 }
 0x349   : > { %v1599_v63 = vsel %vm3501_vm12, %v2164_v22, %v2058_v25  ;;  %v1595_v62 = vsel %vm3502_vm7, %v2165_v9, %v2057_v28 }
 0x34d   : > { %v2051_v60 = vpop.permute.xlu0 %2050 }
 0x34e   : > { %v2053_v23 = vunpack.i.h.bf16 %v2051_v60  ;;  %v2052_v18 = vunpack.i.l.bf16 %v2051_v60  ;;  %v2167_v60 = vld [vmem:[#allocation2] sm:$0xff] }
 0x350   : > { %v1612_v27 = vsel %vm1602_vm14, %v1598_v2, %v2053_v23 }
 0x356   : > { %v3319_v20 = vpop.permute.xlu2 %2065 }
 0x357   : > { %v2067_v24 = vunpack.i.l.bf16 %v3319_v20  ;;  %v2068_v29 = vunpack.i.h.bf16 %v3319_v20 }
 0x359   : > { %v1591_v55 = vsel %vm3497_vm0, %v2161_v61, %v2067_v24  ;;  %v1596_v11 = vsel %vm3503_vm10, %v2166_v40, %v2068_v29  ;;  %v2168_v24 = vld [vmem:[#allocation2 + $0x58] sm:$0xff] }
 0x35e   : > { %v3321_v58 = vpop.permute.xlu2 %2085  ;;  %v2061_v19 = vpop.permute.xlu0 %2060 }
 0x35f   : > { %v2087_v59 = vunpack.i.l.bf16 %v3321_v58  ;;  %v2063_v47 = vunpack.i.h.bf16 %v2061_v19  ;;  %v2062_v34 = vunpack.i.l.bf16 %v2061_v19 }
 0x361   : > { %v1592_v0 = vsel %vm3498_vm4, %v2854_v36, %v2087_v59  ;;  %v1594_v36 = vsel %vm3500_vm11, %v2163_v54, %v2047_v13  ;;  %v1609_v3 = vsel %vm1602_vm14, %v1595_v62, %v2062_v34  ;;  %v1613_v15 = vsel %vm1602_vm14, %v1599_v63, %v2063_v47  ;;  %v2170_v13 = vld [vmem:[#allocation2 + $0x60] sm:$0xff] }
 0x362   : > { %v1608_v57 = vsel %vm1602_vm14, %v1594_v36, %v2052_v18  ;;  %v2134_v34 = vld [vmem:[%s3436_s4] ss:$0 sm:$0xff] }
 0x367   : > { %v3324_v7 = vpop.permute.xlu2 %2115 }
 0x368   : > { %v2117_v38 = vunpack.i.l.bf16 %v3324_v7  ;;  %v2118_v30 = vunpack.i.h.bf16 %v3324_v7 }
 0x36d   : > { %v2076_v4 = vpop.permute.xlu1 %2075 }
 0x36e   : > { %v3326_v14 = vpop.permute.xlu0 %2070  ;;  %v2078_v10 = vunpack.i.h.bf16 %v2076_v4  ;;  %v2077_v45 = vunpack.i.l.bf16 %v2076_v4 }
 0x36f   : > { %v2072_v48 = vunpack.i.l.bf16 %v3326_v14  ;;  %v3336_v49 = vpop.permute.xlu2 %2125  ;;  %v2073_v5 = vunpack.i.h.bf16 %v3326_v14 }
 0x370   : > { %v2127_v42 = vunpack.i.l.bf16 %v3336_v49  ;;  %v1589_v19 = vsel %vm3504_vm2, %v2167_v60, %v2078_v10  ;;  %v1600_v14 = vsel %vm3505_vm5, %v2168_v24, %v2077_v45  ;;  %v2128_v16 = vunpack.i.h.bf16 %v3336_v49 }
 0x371   : > { %v1605_v12 = vsel %vm1602_vm14, %v1591_v55, %v2072_v48  ;;  %v1610_v20 = vsel %vm1602_vm14, %v1596_v11, %v2073_v5 }
 0x372   : > { %v1619_v35 = vsel %vm1616_vm9, %v1605_v12, %v2117_v38  ;;  %v2088_v12 = vunpack.i.h.bf16 %v3321_v58  ;;  %v1624_v7 = vsel %vm1616_vm9, %v1610_v20, %v2118_v30 }
 0x373   : > { %1672 = vmatmul.f32.vlgmr.msra.gmra.mxu1 %v1619_v35 }
 0x376   : > { %v3333_v52 = vpop.permute.xlu0 %2080 }
 0x377   : > { %v2083_v56 = vunpack.i.h.bf16 %v3333_v52  ;;  %v2082_v39 = vunpack.i.l.bf16 %v3333_v52  ;;  %v1454_v2 = vpop.permute.xlu2 %1453 }
 0x379   : > { %v1603_v55 = vsel %vm1602_vm14, %v1589_v19, %v2083_v56  ;;  %v1614_v38 = vsel %vm1602_vm14, %v1600_v14, %v2082_v39 }
 0x37e   : > { %v3338_v1 = vpop.permute.xlu0 %2090  ;;  %v3340_v46 = vpop.permute.xlu1 %2095 }
 0x37f   : > { %v2092_v33 = vunpack.i.l.bf16 %v3338_v1  ;;  %v2093_v52 = vunpack.i.h.bf16 %v3338_v1  ;;  %v2098_v17 = vunpack.i.h.bf16 %v3340_v46 }
 0x381   : > { %v1606_v53 = vsel %vm1602_vm14, %v1592_v0, %v2092_v33  ;;  %v2097_v33 = vunpack.i.l.bf16 %v3340_v46  ;;  %v2169_v0 = vld [vmem:[#allocation2 + $0x40] sm:$0xff] }
 0x382   : > { %v1620_v37 = vsel %vm1616_vm9, %v1606_v53, %v2127_v42  ;;  %v1597_v42 = vsel %vm3506_vm8, %v2169_v0, %v2088_v12 }
 0x383   : > { %1675 = vmatmul.f32.gmra.mxu1 %v1620_v37  ;;  %v1611_v58 = vsel %vm1602_vm14, %v1597_v42, %v2093_v52  ;;  %v1601_v23 = vsel %vm3507_vm13, %v2170_v13, %v2097_v33 }
 0x384   : > { %v1625_v1 = vsel %vm1616_vm9, %v1611_v58, %v2128_v16 }
 0x386   : > { %v2106_v32 = vpop.permute.xlu1 %2105  ;;  %v2101_v59 = vpop.permute.xlu0 %2100 }
 0x387   : > { %v2108_v6 = vunpack.i.h.bf16 %v2106_v32  ;;  %v2107_v26 = vunpack.i.l.bf16 %v2106_v32  ;;  %v2102_v53 = vunpack.i.l.bf16 %v2101_v59  ;;  %v2103_v54 = vunpack.i.h.bf16 %v2101_v59 }
 0x389   : > { %v1622_v50 = vsel %vm1616_vm9, %v1608_v57, %v2107_v26  ;;  %v1626_v31 = vsel %vm1616_vm9, %v1612_v27, %v2108_v6  ;;  %v1615_v18 = vsel %vm1602_vm14, %v1601_v23, %v2102_v53  ;;  %v2171_v26 = vld [vmem:[#allocation2 + $0x20] sm:$0xff]  ;;  %v2172_v57 = vld [vmem:[#allocation2 + $0x8] sm:$0xff] }
 0x38a   : > { %1681 = vmatmul.f32.vlgmr.msra.gmra.mxu2 %v1622_v50  ;;  %1693 = vmatmul.f32.vlgmr.msra.gmra.mxu3 %v1626_v31  ;;  %v1593_v49 = vsel %vm3508_vm1, %v2171_v26, %v1454_v2  ;;  %v1590_v27 = vsel %vm3509_vm3, %v2172_v57, %v2098_v17 }
 0x38b   : > { %v1604_v28 = vsel %vm1602_vm14, %v1590_v27, %v2103_v54 }
 0x38e   : > { %v2111_v43 = vpop.permute.xlu1 %2110  ;;  %v1506_v36 = vpop.permute.xlu0 %1505 }
 0x38f   : > { %v2113_v8 = vunpack.i.h.bf16 %v2111_v43  ;;  %v2112_v44 = vunpack.i.l.bf16 %v2111_v43  ;;  %v1607_v25 = vsel %vm1602_vm14, %v1593_v49, %v1506_v36 }
 0x391   : > { %v1623_v21 = vsel %vm1616_vm9, %v1609_v3, %v2112_v44  ;;  %v1627_v41 = vsel %vm1616_vm9, %v1613_v15, %v2113_v8 }
 0x392   : > { %1684 = vmatmul.f32.gmra.mxu2 %v1623_v21  ;;  %1696 = vmatmul.f32.gmra.mxu3 %v1627_v41 }
 0x396   : > { %v2121_v51 = vpop.permute.xlu1 %2120 }
 0x397   : > { %v2123_v48 = vunpack.i.h.bf16 %v2121_v51  ;;  %v2122_v61 = vunpack.i.l.bf16 %v2121_v51 }
 0x399   : > { %v1617_v35 = vsel %vm1616_vm9, %v1603_v55, %v2123_v48  ;;  %v1628_v4 = vsel %vm1616_vm9, %v1614_v38, %v2122_v61 }
 0x39a   : > { %1666 = vmatmul.f32.vlgmr.msra.gmra.mxu0 %v1617_v35  ;;  %1687 = vmatmul.f32.gmra.mxu2 %v1624_v7 }
 0x39b   : > { %1699 = vmatmul.f32.gmra.mxu3 %v1628_v4 }
 0x39e   : > { %v1574_v37 = vpop.permute.xlu1 %1573 }
 0x39f   : > { %v1629_v32 = vsel %vm1616_vm9, %v1615_v18, %v1574_v37 }
 0x3a2   : > { %1690 = vmatmul.f32.gmra.mxu2 %v1625_v1 }
 0x3a3   : > { %1702 = vmatmul.f32.gmra.mxu3 %v1629_v32 }
 0x3a6   : > { %v2131_v6 = vpop.permute.xlu1 %2130 }
 0x3a7   : > { %v2133_v50 = vunpack.i.h.bf16 %v2131_v6  ;;  %v2132_v31 = vunpack.i.l.bf16 %v2131_v6 }
 0x3a9   : > { %v1618_v46 = vsel %vm1616_vm9, %v1604_v28, %v2132_v31  ;;  %v1621_v47 = vsel %vm1616_vm9, %v1607_v25, %v2133_v50 }
 0x3aa   : > { %1669 = vmatmul.f32.gmra.mxu0 %v1618_v46  ;;  %1678 = vmatmul.f32.gmra.mxu1 %v1621_v47 }
 0x3f0   : > { %v1673_v43 = vpop.f32.mrf.mxu1 }
 0x3f1   : > { %v1674_v22 = vadd.f32 %v2134_v34, %v1673_v43 }
 0x3f3   : > { %v1708_v63 = vmax.f32 %v1674_v22, 0.0 }
 0x3f5   : > { %1721 = vst [vmem:[%s2343_s7 + $0x10] sm:$0xff] %v1708_v63 }
 0x400   : > { %v1676_v9 = vpop.f32.mrf.mxu1 }
 0x401   : > { %v1677_v62 = vadd.f32 %v2134_v34, %v1676_v9 }
 0x403   : > { %v1709_v8 = vmax.f32 %v1677_v62, 0.0 }
 0x405   : > { %1722 = vst [vmem:[%s2343_s7 + $0x18] sm:$0xff] %v1709_v8 }
 0x40d   : > { %v1682_v44 = vpop.f32.mrf.mxu2  ;;  %v1694_v3 = vpop.f32.mrf.mxu3 }
 0x40e   : > { %v1683_v15 = vadd.f32 %v2134_v34, %v1682_v44  ;;  %v1695_v29 = vadd.f32 %v2134_v34, %v1694_v3 }
 0x410   : > { %v1711_v21 = vmax.f32 %v1683_v15, 0.0  ;;  %v1715_v41 = vmax.f32 %v1695_v29, 0.0 }
 0x412   : > { %1724 = vst [vmem:[%s2343_s7 + $0x28] sm:$0xff] %v1711_v21 }
 0x413   : > { %1728 = vst [vmem:[%s2343_s7 + $0x48] sm:$0xff] %v1715_v41 }
 0x415   : > { %v1685_v5 = vpop.f32.mrf.mxu2  ;;  %v1697_v10 = vpop.f32.mrf.mxu3 }
 0x416   : > { %v1686_v45 = vadd.f32 %v2134_v34, %v1685_v5  ;;  %v1698_v56 = vadd.f32 %v2134_v34, %v1697_v10 }
 0x417   : > { %v1667_v39 = vpop.f32.mrf.mxu0 }
 0x418   : > { %v1712_v40 = vmax.f32 %v1686_v45, 0.0  ;;  %v1716_v11 = vmax.f32 %v1698_v56, 0.0  ;;  %v1668_v30 = vadd.f32 %v2134_v34, %v1667_v39 }
 0x41a   : > { %1725 = vst [vmem:[%s2343_s7 + $0x30] sm:$0xff] %v1712_v40  ;;  %v1706_v51 = vmax.f32 %v1668_v30, 0.0 }
 0x41b   : > { %1729 = vst [vmem:[%s2343_s7 + $0x50] sm:$0xff] %v1716_v11 }
 0x41c   : > { %1719 = vst [vmem:[%s2343_s7] sm:$0xff] %v1706_v51 }
 0x41d   : > { %v1688_v20 = vpop.f32.mrf.mxu2 }
 0x41e   : > { %v1689_v60 = vadd.f32 %v2134_v34, %v1688_v20  ;;  %v1700_v19 = vpop.f32.mrf.mxu3 }
 0x41f   : > { %v1701_v24 = vadd.f32 %v2134_v34, %v1700_v19 }
 0x420   : > { %v1713_v14 = vmax.f32 %v1689_v60, 0.0 }
 0x421   : > { %v1717_v48 = vmax.f32 %v1701_v24, 0.0 }
 0x422   : > { %1726 = vst [vmem:[%s2343_s7 + $0x38] sm:$0xff] %v1713_v14 }
 0x423   : > { %1730 = vst [vmem:[%s2343_s7 + $0x58] sm:$0xff] %v1717_v48 }
 0x425   : > { %v1691_v61 = vpop.f32.mrf.mxu2 }
 0x426   : > { %v1692_v55 = vadd.f32 %v2134_v34, %v1691_v61  ;;  %v1703_v38 = vpop.f32.mrf.mxu3 }
 0x427   : > { %v1704_v12 = vadd.f32 %v2134_v34, %v1703_v38  ;;  %v1670_v35 = vpop.f32.mrf.mxu0  ;;  %v1679_v7 = vpop.f32.mrf.mxu1 }
 0x428   : > { %v1714_v4 = vmax.f32 %v1692_v55, 0.0  ;;  %v1671_v52 = vadd.f32 %v2134_v34, %v1670_v35  ;;  %v1680_v59 = vadd.f32 %v2134_v34, %v1679_v7 }
 0x429   : > { %v1718_v33 = vmax.f32 %v1704_v12, 0.0 }
 0x42a   : > { %1727 = vst [vmem:[%s2343_s7 + $0x40] sm:$0xff] %v1714_v4  ;;  %v1707_v0 = vmax.f32 %v1671_v52, 0.0  ;;  %v1710_v42 = vmax.f32 %v1680_v59, 0.0 }
 0x42b   : > { %1731 = vst [vmem:[%s2343_s7 + $0x60] sm:$0xff] %v1718_v33 }
 0x42c   : > { %1720 = vst [vmem:[%s2343_s7 + $0x8] sm:$0xff] %v1707_v0 }
 0x42d   : > { %1723 = vst [vmem:[%s2343_s7 + $0x20] sm:$0xff] %v1710_v42 }
 0x42e PF: > { %s15_s24 = sadd.s32 1, %s2231_s24   ;;  %s3510_s18 = smov %s2211_s19 }
 0x42f   : > { %p12_p0 = scmp.ge.s32.totalorder %s15_s24, 6   ;;  %s3511_s19 = smov %s2327_s6 }
 0x430   : > { %s3512_s20 = smov %s2223_s22  ;;  %s3513_s21 = smov %s2227_s23 }
 0x431   : > { %s3514_s22 = smov %s3517_s25  ;;  %s3515_s23 = smov %s3521_s26 }
 0x432   :  { %14 = sbr.rel (!%p12_p0) target bundleno = 4 (0x4), region = 147 }

</bundles_post_ra>
